<compile_context>
chip_gen: v7x
topology: tpu7x:2x2x1
jax: 0.10.0
libtpu: 0.0.40
codegen_flags: <defaults>
</compile_context>

<pallas_src>
import functools

import jax
import jax.numpy as jnp
from jax.experimental import pallas as pl
from jax.experimental.pallas import tpu as pltpu

_LANE = 128
_N_LAYERS = 3


def _round_up(x, m):
    return ((x + m - 1) // m) * m


def _softplus(x):
    # matches torch.nn.Softplus(beta=1, threshold=20)
    return jnp.where(x > 20.0, x, jnp.log1p(jnp.exp(jnp.minimum(x, 20.0))))


def _vmem_budget_bytes():
    """Generation-aware scoped-VMEM limit.

    v5e/v6e have 128 MiB physical VMEM -> ~96 MiB budget; v7x has 64 MiB per
    TensorCore -> ~48 MiB budget (review items: raise the hard-coded 32 MiB on
    v5e/v6e, cap below 64 MiB on v7x)."""
    cap = 128 << 20
    try:
        info = pltpu.get_tpu_info()
        for name in ("vmem_capacity_bytes", "vmem_bytes", "vmem_size_bytes"):
            val = getattr(info, name, None)
            if val:
                cap = int(val)
                break
    except Exception:
        pass
    return max(24 << 20, min((cap * 3) // 4, 100 << 20))


def _plan_tiles(B, Lp, Cp, mm_bytes, out_bytes, budget, tl_override=None):
    """Pick (h_resident, tl): largest row tile whose resident set + per-step
    f32 temporaries (+ streamed-H double buffer, if needed) fit the budget."""
    fixed = (B * Lp * Cp * 4                      # feature residual, Buffered(1)
             + 2 * B * Lp * Cp * out_bytes        # resident output block (2 bufs)
             + 2 * B * Lp * Cp * mm_bytes         # activation ping/pong scratch
             + 2 * Cp * Cp * mm_bytes             # per-layer GCN weight (2 bufs)
             + 2 * 2 * Lp * _LANE * 4)            # per-layer gamma/beta, lane-padded

    def temps(tl):                                # live f32 temporaries per step
        return 6 * B * tl * Cp * 4

    def h_stream(tl):                             # double-buffered H row-block
        return 2 * B * tl * Lp * mm_bytes

    h_full = B * Lp * Lp * mm_bytes
    if tl_override is not None:
        cands = [tl_override]
    else:
        cands = [t for t in (1024, 768, 512, 384, 256, 128, 64, 32, 16)
                 if Lp % t == 0]

    # Prefer H fully VMEM-resident: read from HBM once for all three layers.
    for t in cands:
        if fixed + h_full + temps(t) <= budget:
            return True, t
    # Otherwise stream H row-blocks (H is re-read once per layer).
    for t in cands:
        if fixed + h_stream(t) + temps(t) <= budget:
            return False, t
    # TODO(synk): fully-streamed fallback (activation tiled through HBM) for
    # shapes whose resident set does not fit VMEM.
    raise NotImplementedError(
        f"HGCN resident set does not fit the VMEM budget ({budget} bytes)")


def _fused_hgcn_kernel(feat_ref, h_ref, w_ref, g_ref, b_ref, out_ref, x_scr,
                       *, tl, c_real, eps, n_layers, h_resident):
    """One (layer, L-row-tile) grid step of the fused 3-layer HGCN.

    feat_ref : (B, Lp, Cp) f32   original feature (resident; residual + seed)
    h_ref    : (B, Lp, Lp) mm    resident adjacency   (h_resident=True)
               (B, tl, Lp) mm    streamed row-block    (h_resident=False)
    w_ref    : (1, Cp, Cp) mm    current layer's GCN weight (zero padded)
    g_ref    : (1, Lp, 1)  f32   current layer's BN weight (per node index)
    b_ref    : (1, Lp, 1)  f32   current layer's BN bias
    out_ref  : (B, Lp, Cp)       resident output block (written at last layer)
    x_scr    : (2, B, Lp, Cp) mm activation ping/pong scratch
    """
    layer = pl.program_id(0)
    t = pl.program_id(1)
    row0 = pl.multiple_of(t * tl, tl)
    B, _, Cp = out_ref.shape

    # First grid step: seed the read slot with the original feature (one cast).
    @pl.when(jnp.logical_and(layer == 0, t == 0))
    def _init():
        x_scr[0] = feat_ref[...].astype(x_scr.dtype)

    parity = layer % 2                      # read slot; write slot is 1 - parity
    x_full = x_scr[parity]                  # (B, Lp, Cp) previous activation

    if h_resident:
        h_tile = h_ref[:, pl.ds(row0, tl), :]          # (B, tl, Lp)
    else:
        h_tile = h_ref[...]                            # streamed (B, tl, Lp)

    # H @ (x @ W) re-associated to (H @ x) @ W: this row tile only needs its H
    # row-block plus the full activation.  Batched MXU matmul, f32 accumulate.
    hx = jax.lax.dot_general(
        h_tile, x_full,
        dimension_numbers=(((2,), (1,)), ((0,), (0,))),
        preferred_element_type=jnp.float32)            # (B, tl, Cp) f32

    # (H x) @ W: no batch dims -> (B, tl) folds into M, one lane-dense matmul.
    # NOTE: when mm dtype is bf16 this adds a second rounding (hx f32 -> bf16)
    # not present in the reference op order; fine at bf16 tolerances, and the
    # f32 path is exact.
    w = w_ref[0]                                       # (Cp, Cp)
    gc = jax.lax.dot_general(
        hx.astype(w.dtype), w,
        dimension_numbers=(((2,), (0,)), ((), ())),
        preferred_element_type=jnp.float32)            # (B, tl, Cp) f32

    # BatchNorm1d(img_len), training-mode stats per node row over (batch,
    # channel), biased variance, one pass (sum & sum-of-squares).  Padded
    # channels of gc are exactly zero (zero-padded W columns), so the sums are
    # unaffected; divide by the REAL element count.
    s1 = jnp.sum(jnp.sum(gc, axis=2, keepdims=True), axis=0, keepdims=True)
    s2 = jnp.sum(jnp.sum(gc * gc, axis=2, keepdims=True), axis=0, keepdims=True)
    inv_n = 1.0 / float(B * c_real)
    mean = s1 * inv_n
    var = s2 * inv_n - mean * mean                     # biased variance
    inv_std = jax.lax.rsqrt(var + eps)

    gamma = g_ref[0, pl.ds(row0, tl), :][None]         # (1, tl, 1)
    beta = b_ref[0, pl.ds(row0, tl), :][None]
    scale = gamma * inv_std
    shift = beta - mean * scale
    bn = gc * scale + shift

    # Residual with the ORIGINAL feature, then Softplus (beta=1, threshold=20).
    feat_tile = feat_ref[:, pl.ds(row0, tl), :]
    act = _softplus(feat_tile + bn)                    # f32

    # Explicitly zero the padded channels so no garbage escapes the kernel.
    if c_real < Cp:
        ch = jax.lax.broadcasted_iota(jnp.int32, (1, 1, Cp), 2)
        act = jnp.where(ch < c_real, act, 0.0)

    # Last layer -> resident output block (single HBM writeback at grid end).
    @pl.when(layer == n_layers - 1)
    def _emit():
        out_ref[:, pl.ds(row0, tl), :] = act.astype(out_ref.dtype)

    # Intermediate layers -> opposite scratch slot (next layer's input).
    # Static slot indices under pl.when keep the stores on the fast path.
    @pl.when(jnp.logical_and(parity == 0, layer < n_layers - 1))
    def _store_to_slot1():
        x_scr[1, :, pl.ds(row0, tl), :] = act.astype(x_scr.dtype)

    @pl.when(jnp.logical_and(parity == 1, layer < n_layers - 1))
    def _store_to_slot0():
        x_scr[0, :, pl.ds(row0, tl), :] = act.astype(x_scr.dtype)


def hgcn_layer(feature, H, params, *, matmul_dtype=jnp.bfloat16, eps=1e-5,
               tl=None):
    """Forward pass of HGCN_layer: 3 x [GraphConvolution -> BatchNorm1d(L) ->
    residual(+feature) -> Softplus], fused into a single Pallas TPU kernel.

    feature: (B, L, C) node features; H: (B, L, L) adjacency.
    params:  w1..w3 (C, C) GCN weights; g1..g3 / b1..b3 (L,) BN affine params.
    """
    B, L, C = feature.shape
    if H.shape != (B, L, L):
        raise ValueError(f"H shape {H.shape} incompatible with feature {feature.shape}")

    Cp = _round_up(C, _LANE)          # lane-dense channel padding
    Lp = _round_up(L, _LANE)          # lane-dense node padding (H last dim / K)
    f32 = jnp.float32
    mm_bytes = jnp.dtype(matmul_dtype).itemsize
    out_dtype = feature.dtype
    out_bytes = jnp.dtype(out_dtype).itemsize

    budget = _vmem_budget_bytes()
    if tl is not None and (Lp % tl != 0 or tl % 16 != 0):
        raise ValueError(f"tile size {tl} must divide padded L={Lp} and be a multiple of 16")
    h_resident, tl = _plan_tiles(B, Lp, Cp, mm_bytes, out_bytes, budget,
                                 tl_override=tl)
    n_tiles = Lp // tl

    # Zero padding: H pad rows/cols zero -> real-row results exact; feature pad
    # rows/channels zero -> residual & layer-0 activation exact.
    feat_p = jnp.pad(feature.astype(f32), ((0, 0), (0, Lp - L), (0, Cp - C)))
    h_p = jnp.pad(H.astype(f32),
                  ((0, 0), (0, Lp - L), (0, Lp - L))).astype(matmul_dtype)

    def pad_w(k):
        return jnp.pad(params[k].astype(f32), ((0, Cp - C), (0, Cp - C)))

    def pad_vec(k, fill):
        v = params[k].astype(f32)
        return jnp.pad(v, (0, Lp - L), constant_values=fill).reshape(Lp, 1)

    w_all = jnp.stack([pad_w('w1'), pad_w('w2'), pad_w('w3')]).astype(matmul_dtype)
    g_all = jnp.stack([pad_vec('g1', 1.0), pad_vec('g2', 1.0), pad_vec('g3', 1.0)])
    b_all = jnp.stack([pad_vec('b1', 0.0), pad_vec('b2', 0.0), pad_vec('b3', 0.0)])

    if h_resident:
        # H is read from HBM exactly once across all three layers.
        h_spec = pl.BlockSpec((B, Lp, Lp), lambda l, t: (0, 0, 0),
                              pipeline_mode=pl.Buffered(1))
        h_reads = 1
    else:
        # H row-blocks streamed & pipelined; re-read once per layer.
        h_spec = pl.BlockSpec((B, tl, Lp), lambda l, t: (0, t, 0))
        h_reads = _N_LAYERS

    flops = _N_LAYERS * (2 * B * Lp * Lp * Cp + 2 * B * Lp * Cp * Cp
                         + 12 * B * Lp * Cp)
    bytes_accessed = (B * Lp * Cp * 4                       # feature
                      + h_reads * B * Lp * Lp * mm_bytes    # adjacency
                      + _N_LAYERS * Cp * Cp * mm_bytes      # weights
                      + 2 * _N_LAYERS * Lp * 4              # BN params
                      + B * Lp * Cp * out_bytes)            # output (written once)

    kernel = functools.partial(
        _fused_hgcn_kernel, tl=tl, c_real=C, eps=eps,
        n_layers=_N_LAYERS, h_resident=h_resident)

    # TODO(synk): BatchNorm1d running-mean/var (momentum=0.1) buffer updates are
    # training-time state, not part of the returned forward value; omitted.
    out = pl.pallas_call(
        kernel,
        out_shape=jax.ShapeDtypeStruct((B, Lp, Cp), out_dtype),
        grid=(_N_LAYERS, n_tiles),
        in_specs=[
            # original feature: resident, single-buffered (review item)
            pl.BlockSpec((B, Lp, Cp), lambda l, t: (0, 0, 0),
                         pipeline_mode=pl.Buffered(1)),
            h_spec,
            # per-layer blocks: index depends only on the slow layer axis ->
            # DMA'd 3 times total, no per-tile descriptor overhead
            pl.BlockSpec((1, Cp, Cp), lambda l, t: (l, 0, 0)),
            pl.BlockSpec((1, Lp, 1), lambda l, t: (l, 0, 0)),
            pl.BlockSpec((1, Lp, 1), lambda l, t: (l, 0, 0)),
        ],
        # resident lane-dense output block: written back to HBM exactly once
        out_specs=pl.BlockSpec((B, Lp, Cp), lambda l, t: (0, 0, 0)),
        scratch_shapes=[pltpu.VMEM((2, B, Lp, Cp), matmul_dtype)],
        compiler_params=pltpu.CompilerParams(
            # tile axis carries a cross-tile dependency through the activation
            # scratch -> sequential; layer axis is inherently sequential.
            dimension_semantics=("arbitrary", "arbitrary"),
            vmem_limit_bytes=int(budget)),
        cost_estimate=pl.CostEstimate(
            flops=int(flops),
            transcendentals=int(2 * _N_LAYERS * B * Lp * Cp),
            bytes_accessed=int(bytes_accessed)),
    )(feat_p, h_p, w_all, g_all, b_all)

    return out[:, :L, :C]


def _reference(feature, H, params, eps=1e-5):
    """Pure-JAX f32 reference with the original PyTorch op order."""
    f32 = jnp.float32
    feature = feature.astype(f32)
    Hf = H.astype(f32)
    hi = jax.lax.Precision.HIGHEST

    def bn(x, g, b):
        mean = jnp.mean(x, axis=(0, 2), keepdims=True)
        var = jnp.mean((x - mean) ** 2, axis=(0, 2), keepdims=True)
        xn = (x - mean) * jax.lax.rsqrt(var + eps)
        return xn * g.reshape(1, -1, 1) + b.reshape(1, -1, 1)

    def block(x, w, g, b):
        support = jnp.einsum('blc,cd->bld', x, w.astype(f32), precision=hi)
        gc = jnp.einsum('blk,bkd->bld', Hf, support, precision=hi)
        return _softplus(feature + bn(gc, g.astype(f32), b.astype(f32)))

    x = feature
    for wk, gk, bk in (("w1", "g1", "b1"), ("w2", "g2", "b2"),
                       ("w3", "g3", "b3")):
        x = block(x, params[wk], params[gk], params[bk])
    return x


if __name__ == "__main__":
    B, L, C = 2, 16, 32   # batch, img_len, in_c
    key = jax.random.PRNGKey(0)
    kf, kh, k1, k2, k3 = jax.random.split(key, 5)

    feature = jax.random.normal(kf, (B, L, C), dtype=jnp.float32)
    # adjacency-like matrix (row-normalized, non-negative)
    H_raw = jax.random.uniform(kh, (B, L, L), dtype=jnp.float32)
    H = H_raw / jnp.sum(H_raw, axis=-1, keepdims=True)

    # GraphConvolution weights: xavier_normal_ on (in_c, in_c)
    xav_std = (2.0 / (C + C)) ** 0.5
    params = {
        'w1': xav_std * jax.random.normal(k1, (C, C), dtype=jnp.float32),
        'w2': xav_std * jax.random.normal(k2, (C, C), dtype=jnp.float32),
        'w3': xav_std * jax.random.normal(k3, (C, C), dtype=jnp.float32),
        # BatchNorm1d affine params at PyTorch init: weight=1, bias=0
        'g1': jnp.ones((L,), jnp.float32), 'b1': jnp.zeros((L,), jnp.float32),
        'g2': jnp.ones((L,), jnp.float32), 'b2': jnp.zeros((L,), jnp.float32),
        'g3': jnp.ones((L,), jnp.float32), 'b3': jnp.zeros((L,), jnp.float32),
    }

    ref = _reference(feature, H, params)

    # Performance path: fused 3-layer kernel, bf16 MXU operands, auto tile.
    run_bf16 = jax.jit(functools.partial(hgcn_layer, matmul_dtype=jnp.bfloat16))
    out = jax.block_until_ready(run_bf16(feature, H, params))
    assert out.shape == (B, L, C)
    assert out.dtype == feature.dtype
    assert bool(jnp.all(jnp.isfinite(out)))
    assert jnp.allclose(out, ref, atol=5e-2, rtol=5e-2)

    # Full-f32 path: tight check of the (H@x)@W re-association, L/C padding,
    # fused layer loop and one-pass BN against the original-order reference.
    run_f32 = jax.jit(functools.partial(hgcn_layer, matmul_dtype=jnp.float32))
    out_f32 = jax.block_until_ready(run_f32(feature, H, params))
    assert jnp.allclose(out_f32, ref, atol=1e-3, rtol=1e-3)

    print("KERNEL_OK")
</pallas_src>

<mosaic_0001>
module attributes {stable_mosaic.version = 11 : i64} {
  func.func @_fused_hgcn_kernel(%arg0: i32, %arg1: i32, %arg2: memref<2x128x128xf32, #tpu.memory_space<vmem>>, %arg3: memref<2x128x128xbf16, #tpu.memory_space<vmem>>, %arg4: memref<1x128x128xbf16, #tpu.memory_space<vmem>>, %arg5: memref<1x128x1xf32, #tpu.memory_space<vmem>>, %arg6: memref<1x128x1xf32, #tpu.memory_space<vmem>>, %arg7: memref<2x128x128xf32, #tpu.memory_space<vmem>>, %arg8: memref<2x2x128x128xbf16, #tpu.memory_space<vmem>>) attributes {dimension_semantics = [#tpu.dimension_semantics<arbitrary>, #tpu.dimension_semantics<arbitrary>], iteration_bounds = array<i64: 3, 1>, scalar_prefetch = 0 : i64, scratch_operands = 1 : i64, tpu.core_type = #tpu.core_type<tc>, window_params = [{pipeline_mode = #tpu.pipeline_mode<synchronous>, transform_indices = @transform_0, window_bounds = array<i64: 2, 128, 128>}, {pipeline_mode = #tpu.pipeline_mode<synchronous>, transform_indices = @transform_1, window_bounds = array<i64: 2, 128, 128>}, {transform_indices = @transform_2, window_bounds = array<i64: 1, 128, 128>}, {transform_indices = @transform_3, window_bounds = array<i64: 1, 128, 1>}, {transform_indices = @transform_4, window_bounds = array<i64: 1, 128, 1>}, {pipeline_mode = #tpu.pipeline_mode<synchronous>, transform_indices = @transform_5, window_bounds = array<i64: 2, 128, 128>}]} {
    %c128_i32 = arith.constant 128 : i32
    %0 = arith.muli %arg1, %c128_i32 : i32
    %1 = tpu.assume_multiple %0, 128 : i32
    %c0_i32 = arith.constant 0 : i32
    %2 = arith.cmpi eq, %arg0, %c0_i32 : i32
    %c0_i32_0 = arith.constant 0 : i32
    %3 = arith.cmpi eq, %arg1, %c0_i32_0 : i32
    %4 = arith.andi %2, %3 : i1
    %5 = arith.extui %4 : i1 to i32
    %c0_i32_1 = arith.constant 0 : i32
    %6 = arith.cmpi ne, %5, %c0_i32_1 : i32
    scf.if %6 {
      %c0_38 = arith.constant 0 : index
      %c0_39 = arith.constant 0 : index
      %c0_40 = arith.constant 0 : index
      %90 = vector.load %arg2[%c0_38, %c0_39, %c0_40] : memref<2x128x128xf32, #tpu.memory_space<vmem>>, vector<2x128x128xf32>
      %91 = arith.truncf %90 : vector<2x128x128xf32> to vector<2x128x128xbf16>
      %c0_41 = arith.constant 0 : index
      %c0_42 = arith.constant 0 : index
      %c0_43 = arith.constant 0 : index
      %c0_44 = arith.constant 0 : index
      %92 = vector.load %arg8[%c0_41, %c0_42, %c0_43, %c0_44] : memref<2x2x128x128xbf16, #tpu.memory_space<vmem>>, vector<1x2x128x128xbf16>
      %93 = vector.shape_cast %92 : vector<1x2x128x128xbf16> to vector<2x128x128xbf16>
      %94 = vector.shape_cast %91 : vector<2x128x128xbf16> to vector<1x2x128x128xbf16>
      tpu.vector_store %arg8[%c0_41, %c0_42, %c0_43, %c0_44], %94 {strides = array<i32>} : memref<2x2x128x128xbf16, #tpu.memory_space<vmem>>, vector<1x2x128x128xbf16>,
    } else {
    }
    %c2_i32 = arith.constant 2 : i32
    %c0_i32_2 = arith.constant 0 : i32
    %7 = arith.cmpi eq, %c2_i32, %c0_i32_2 : i32
    %c1_i32 = arith.constant 1 : i32
    %8 = arith.select %7, %c1_i32, %c2_i32 : i32
    %9 = arith.remsi %arg0, %8 : i32
    %c0_i32_3 = arith.constant 0 : i32
    %10 = arith.cmpi ne, %9, %c0_i32_3 : i32
    %c0_i32_4 = arith.constant 0 : i32
    %11 = arith.cmpi slt, %9, %c0_i32_4 : i32
    %c0_i32_5 = arith.constant 0 : i32
    %12 = arith.cmpi slt, %8, %c0_i32_5 : i32
    %13 = arith.xori %11, %12 : i1
    %14 = arith.andi %13, %10 : i1
    %15 = arith.addi %9, %8 : i32
    %16 = arith.select %14, %15, %9 : i32
    %17 = arith.index_cast %16 : i32 to index
    %c0 = arith.constant 0 : index
    %c0_6 = arith.constant 0 : index
    %c0_7 = arith.constant 0 : index
    %18 = vector.load %arg8[%17, %c0, %c0_6, %c0_7] : memref<2x2x128x128xbf16, #tpu.memory_space<vmem>>, vector<1x2x128x128xbf16>
    %19 = vector.shape_cast %18 : vector<1x2x128x128xbf16> to vector<2x128x128xbf16>
    %c0_8 = arith.constant 0 : index
    %20 = arith.index_cast %1 : i32 to index
    %c0_9 = arith.constant 0 : index
    %21 = vector.load %arg3[%c0_8, %20, %c0_9] : memref<2x128x128xbf16, #tpu.memory_space<vmem>>, vector<2x128x128xbf16>
    %cst = arith.constant dense<0.000000e+00> : vector<2x128x128xf32>
    %22 = tpu.matmul %21, %19, %cst {dimension_numbers = #tpu.dot_dimension_numbers<[2], [1], [1], [2], [0, 0, 0, 1, 1, 2], [0], [0]>} : vector<2x128x128xbf16>, vector<2x128x128xbf16>, vector<2x128x128xf32> -> vector<2x128x128xf32>
    %c0_10 = arith.constant 0 : index
    %c0_11 = arith.constant 0 : index
    %c0_12 = arith.constant 0 : index
    %23 = vector.load %arg4[%c0_10, %c0_11, %c0_12] : memref<1x128x128xbf16, #tpu.memory_space<vmem>>, vector<1x128x128xbf16>
    %24 = vector.shape_cast %23 : vector<1x128x128xbf16> to vector<128x128xbf16>
    %25 = arith.truncf %22 : vector<2x128x128xf32> to vector<2x128x128xbf16>
    %cst_13 = arith.constant dense<0.000000e+00> : vector<2x128x128xf32>
    %26 = tpu.matmul %25, %24, %cst_13 {dimension_numbers = #tpu.dot_dimension_numbers<[2], [0], [0, 1], [1], [0, 0, 0, 1, 1, 1], [], []>} : vector<2x128x128xbf16>, vector<128x128xbf16>, vector<2x128x128xf32> -> vector<2x128x128xf32>
    %cst_14 = arith.constant dense<0.000000e+00> : vector<2x128xf32>
    %27 = vector.multi_reduction <add>, %26, %cst_14 [2] : vector<2x128x128xf32> to vector<2x128xf32>
    %28 = vector.shape_cast %27 : vector<2x128xf32> to vector<2x128x1xf32>
    %cst_15 = arith.constant dense<0.000000e+00> : vector<128x1xf32>
    %29 = vector.multi_reduction <add>, %28, %cst_15 [0] : vector<2x128x1xf32> to vector<128x1xf32>
    %30 = vector.shape_cast %29 : vector<128x1xf32> to vector<1x128x1xf32>
    %31 = arith.mulf %26, %26 : vector<2x128x128xf32>
    %cst_16 = arith.constant dense<0.000000e+00> : vector<2x128xf32>
    %32 = vector.multi_reduction <add>, %31, %cst_16 [2] : vector<2x128x128xf32> to vector<2x128xf32>
    %33 = vector.shape_cast %32 : vector<2x128xf32> to vector<2x128x1xf32>
    %cst_17 = arith.constant dense<0.000000e+00> : vector<128x1xf32>
    %34 = vector.multi_reduction <add>, %33, %cst_17 [0] : vector<2x128x1xf32> to vector<128x1xf32>
    %35 = vector.shape_cast %34 : vector<128x1xf32> to vector<1x128x1xf32>
    %cst_18 = arith.constant 1.562500e-02 : f32
    %36 = vector.broadcast %cst_18 : f32 to vector<1x128x1xf32>
    %37 = arith.mulf %30, %36 : vector<1x128x1xf32>
    %cst_19 = arith.constant 1.562500e-02 : f32
    %38 = vector.broadcast %cst_19 : f32 to vector<1x128x1xf32>
    %39 = arith.mulf %35, %38 : vector<1x128x1xf32>
    %40 = arith.mulf %37, %37 : vector<1x128x1xf32>
    %41 = arith.subf %39, %40 : vector<1x128x1xf32>
    %cst_20 = arith.constant 9.99999974E-6 : f32
    %42 = vector.broadcast %cst_20 : f32 to vector<1x128x1xf32>
    %43 = arith.addf %41, %42 : vector<1x128x1xf32>
    %44 = math.rsqrt %43 : vector<1x128x1xf32>
    %c0_21 = arith.constant 0 : index
    %45 = arith.index_cast %1 : i32 to index
    %c0_22 = arith.constant 0 : index
    %46 = vector.load %arg5[%c0_21, %45, %c0_22] : memref<1x128x1xf32, #tpu.memory_space<vmem>>, vector<1x128x1xf32>
    %47 = vector.shape_cast %46 : vector<1x128x1xf32> to vector<128x1xf32>
    %48 = vector.shape_cast %47 : vector<128x1xf32> to vector<1x128x1xf32>
    %c0_23 = arith.constant 0 : index
    %49 = arith.index_cast %1 : i32 to index
    %c0_24 = arith.constant 0 : index
    %50 = vector.load %arg6[%c0_23, %49, %c0_24] : memref<1x128x1xf32, #tpu.memory_space<vmem>>, vector<1x128x1xf32>
    %51 = vector.shape_cast %50 : vector<1x128x1xf32> to vector<128x1xf32>
    %52 = vector.shape_cast %51 : vector<128x1xf32> to vector<1x128x1xf32>
    %53 = arith.mulf %48, %44 : vector<1x128x1xf32>
    %54 = arith.mulf %37, %53 : vector<1x128x1xf32>
    %55 = arith.subf %52, %54 : vector<1x128x1xf32>
    %56 = vector.broadcast %53 : vector<1x128x1xf32> to vector<2x128x128xf32>
    %57 = arith.mulf %26, %56 : vector<2x128x128xf32>
    %58 = vector.broadcast %55 : vector<1x128x1xf32> to vector<2x128x128xf32>
    %59 = arith.addf %57, %58 : vector<2x128x128xf32>
    %c0_25 = arith.constant 0 : index
    %60 = arith.index_cast %1 : i32 to index
    %c0_26 = arith.constant 0 : index
    %61 = vector.load %arg2[%c0_25, %60, %c0_26] : memref<2x128x128xf32, #tpu.memory_space<vmem>>, vector<2x128x128xf32>
    %62 = arith.addf %61, %59 : vector<2x128x128xf32>
    %cst_27 = arith.constant 2.000000e+01 : f32
    %63 = vector.broadcast %cst_27 : f32 to vector<2x128x128xf32>
    %64 = arith.cmpf ogt, %62, %63 : vector<2x128x128xf32>
    %cst_28 = arith.constant 2.000000e+01 : f32
    %65 = vector.broadcast %cst_28 : f32 to vector<2x128x128xf32>
    %66 = arith.minimumf %62, %65 : vector<2x128x128xf32>
    %67 = math.exp %66 : vector<2x128x128xf32>
    %68 = math.log1p %67 : vector<2x128x128xf32>
    %69 = arith.select %64, %62, %68 : vector<2x128x128xi1>, vector<2x128x128xf32>
    %70 = tpu.iota {dimensions = array<i32: 2>} : vector<1x1x128xi32>
    %c32_i32 = arith.constant 32 : i32
    %71 = vector.broadcast %c32_i32 : i32 to vector<1x1x128xi32>
    %72 = arith.cmpi slt, %70, %71 : vector<1x1x128xi32>
    %cst_29 = arith.constant 0.000000e+00 : f32
    %73 = vector.shape_cast %72 : vector<1x1x128xi1> to vector<1x1x128xi1>
    %74 = vector.broadcast %73 : vector<1x1x128xi1> to vector<2x128x128xi1>
    %75 = vector.broadcast %cst_29 : f32 to vector<2x128x128xf32>
    %76 = arith.select %74, %69, %75 : vector<2x128x128xi1>, vector<2x128x128xf32>
    %c2_i32_30 = arith.constant 2 : i32
    %77 = arith.cmpi eq, %arg0, %c2_i32_30 : i32
    %78 = arith.extui %77 : i1 to i32
    %c0_i32_31 = arith.constant 0 : i32
    %79 = arith.cmpi ne, %78, %c0_i32_31 : i32
    scf.if %79 {
      %c0_38 = arith.constant 0 : index
      %90 = arith.index_cast %1 : i32 to index
      %c0_39 = arith.constant 0 : index
      %91 = vector.load %arg7[%c0_38, %90, %c0_39] : memref<2x128x128xf32, #tpu.memory_space<vmem>>, vector<2x128x128xf32>
      tpu.vector_store %arg7[%c0_38, %90, %c0_39], %76 {strides = array<i32>} : memref<2x128x128xf32, #tpu.memory_space<vmem>>, vector<2x128x128xf32>,
    } else {
    }
    %c0_i32_32 = arith.constant 0 : i32
    %80 = arith.cmpi eq, %16, %c0_i32_32 : i32
    %c2_i32_33 = arith.constant 2 : i32
    %81 = arith.cmpi slt, %arg0, %c2_i32_33 : i32
    %82 = arith.andi %80, %81 : i1
    %83 = arith.extui %82 : i1 to i32
    %c0_i32_34 = arith.constant 0 : i32
    %84 = arith.cmpi ne, %83, %c0_i32_34 : i32
    scf.if %84 {
      %90 = arith.truncf %76 : vector<2x128x128xf32> to vector<2x128x128xbf16>
      %c1 = arith.constant 1 : index
      %c0_38 = arith.constant 0 : index
      %91 = arith.index_cast %1 : i32 to index
      %c0_39 = arith.constant 0 : index
      %92 = vector.load %arg8[%c1, %c0_38, %91, %c0_39] : memref<2x2x128x128xbf16, #tpu.memory_space<vmem>>, vector<1x2x128x128xbf16>
      %93 = vector.shape_cast %92 : vector<1x2x128x128xbf16> to vector<2x128x128xbf16>
      %94 = vector.shape_cast %90 : vector<2x128x128xbf16> to vector<1x2x128x128xbf16>
      tpu.vector_store %arg8[%c1, %c0_38, %91, %c0_39], %94 {strides = array<i32>} : memref<2x2x128x128xbf16, #tpu.memory_space<vmem>>, vector<1x2x128x128xbf16>,
    } else {
    }
    %c1_i32_35 = arith.constant 1 : i32
    %85 = arith.cmpi eq, %16, %c1_i32_35 : i32
    %c2_i32_36 = arith.constant 2 : i32
    %86 = arith.cmpi slt, %arg0, %c2_i32_36 : i32
    %87 = arith.andi %85, %86 : i1
    %88 = arith.extui %87 : i1 to i32
    %c0_i32_37 = arith.constant 0 : i32
    %89 = arith.cmpi ne, %88, %c0_i32_37 : i32
    scf.if %89 {
      %90 = arith.truncf %76 : vector<2x128x128xf32> to vector<2x128x128xbf16>
      %c0_38 = arith.constant 0 : index
      %c0_39 = arith.constant 0 : index
      %91 = arith.index_cast %1 : i32 to index
      %c0_40 = arith.constant 0 : index
      %92 = vector.load %arg8[%c0_38, %c0_39, %91, %c0_40] : memref<2x2x128x128xbf16, #tpu.memory_space<vmem>>, vector<1x2x128x128xbf16>
      %93 = vector.shape_cast %92 : vector<1x2x128x128xbf16> to vector<2x128x128xbf16>
      %94 = vector.shape_cast %90 : vector<2x128x128xbf16> to vector<1x2x128x128xbf16>
      tpu.vector_store %arg8[%c0_38, %c0_39, %91, %c0_40], %94 {strides = array<i32>} : memref<2x2x128x128xbf16, #tpu.memory_space<vmem>>, vector<1x2x128x128xbf16>,
    } else {
    }
    return
  }
  func.func @transform_0(%arg0: i32, %arg1: i32) -> (i32, i32, i32) {
    %c0_i32 = arith.constant 0 : i32
    %c0_i32_0 = arith.constant 0 : i32
    %c0_i32_1 = arith.constant 0 : i32
    %c0_i32_2 = arith.constant 0 : i32
    return %c0_i32, %c0_i32_0, %c0_i32_1 : i32, i32, i32
  }
  func.func @transform_1(%arg0: i32, %arg1: i32) -> (i32, i32, i32) {
    %c0_i32 = arith.constant 0 : i32
    %c0_i32_0 = arith.constant 0 : i32
    %c0_i32_1 = arith.constant 0 : i32
    %c0_i32_2 = arith.constant 0 : i32
    return %c0_i32, %c0_i32_0, %c0_i32_1 : i32, i32, i32
  }
  func.func @transform_2(%arg0: i32, %arg1: i32) -> (i32, i32, i32) {
    %c0_i32 = arith.constant 0 : i32
    %c0_i32_0 = arith.constant 0 : i32
    %c0_i32_1 = arith.constant 0 : i32
    return %arg0, %c0_i32, %c0_i32_0 : i32, i32, i32
  }
  func.func @transform_3(%arg0: i32, %arg1: i32) -> (i32, i32, i32) {
    %c0_i32 = arith.constant 0 : i32
    %c0_i32_0 = arith.constant 0 : i32
    %c0_i32_1 = arith.constant 0 : i32
    return %arg0, %c0_i32, %c0_i32_0 : i32, i32, i32
  }
  func.func @transform_4(%arg0: i32, %arg1: i32) -> (i32, i32, i32) {
    %c0_i32 = arith.constant 0 : i32
    %c0_i32_0 = arith.constant 0 : i32
    %c0_i32_1 = arith.constant 0 : i32
    return %arg0, %c0_i32, %c0_i32_0 : i32, i32, i32
  }
  func.func @transform_5(%arg0: i32, %arg1: i32) -> (i32, i32, i32) {
    %c0_i32 = arith.constant 0 : i32
    %c0_i32_0 = arith.constant 0 : i32
    %c0_i32_1 = arith.constant 0 : i32
    %c0_i32_2 = arith.constant 0 : i32
    return %c0_i32, %c0_i32_0, %c0_i32_1 : i32, i32, i32
  }
}

</mosaic_0001>

<bundles_post_ra>
// kernel: hgcn_layer.1
= control target key start
LH: loop header
LB: loop body
LE: loop exit
PB: predicated region body
PF: predicated region fallthrough
CT: control target
= control target key end

     0   :  { %s4644_s0 = inlined_call_operand.hbm [shape: f32[2,128,128], index: 0, kind: input, shape index: {}]   ;;  %s4645_s1 = inlined_call_operand.hbm [shape: bf16[2,128,128], index: 1, kind: input, shape index: {}]   ;;  %s4646_s2 = inlined_call_operand.hbm [shape: bf16[3,128,128], index: 2, kind: input, shape index: {}]   ;;  %s4647_s3 = inlined_call_operand.hbm [shape: f32[3,128,1], index: 3, kind: input, shape index: {}]   ;;  %s4648_s4 = inlined_call_operand.hbm [shape: f32[3,128,1], index: 4, kind: input, shape index: {}]   ;;  %s4649_s5 = inlined_call_operand.hbm [shape: f32[2,128,128], index: 5, kind: output, shape index: {}]  }
   0x1   :  { %4685 = sst [smem:[#allocation34_spill]] %s4644_s0 }
   0x2   :  { %4686 = sst [smem:[#allocation35_spill]] %s4646_s2 }
   0x3   :  { %4687 = sst [smem:[#allocation36_spill]] %s4647_s3 }
   0x4   :  { %4688 = sst [smem:[#allocation37_spill]] %s4649_s5 }
   0x5   :  { %10 = vsyncpa [#allocation4], 0 }
   0x6   :  { %11 = vsyncpa [#allocation7], 0 }
   0x7   :  { %12 = vsyncpa [#allocation5], 0  ;;  %s3232_s18 = smov 0   ;;  %s3234_s19 = smov 0  }
   0x8   :  { %s3236_s20 = smov 0   ;;  %s3238_s21 = smov 0  }
   0x9   :  { %s3240_s22 = smov 0   ;;  %s3242_s23 = smov 0  }
   0xa LB: > { %s3261_s24 = sadd.s32 4294967295, %s3187_s23   ;;  %s79_s25 = sadd.s32 1, %s3175_s20  ;;  %s3187_s23 = sphi %s3242_s23, %s18_s23   ;;  %s3183_s22 = sphi %s3240_s22, %s4794_s22   ;;  %s3179_s21 = sphi %s3238_s21, %s4793_s21   ;;  %s3175_s20 = sphi %s3236_s20, %s4792_s20   ;;  %s3171_s19 = sphi %s3234_s19, %s4791_s19   ;;  %s3167_s18 = sphi %s3232_s18, %s4790_s18  }
   0xb   : > { %p86_p0 = scmp.ne.s32.totalorder %s3175_s20, %s3171_s19  ;;  %p87_p1 = scmp.eq.s32.totalorder %s3187_s23, 0 }
   0xc   : > { %p92_p2 = scmp.ne.s32.totalorder %s3171_s19, %s3167_s18  ;;  %p4650_p3 = scmp.eq.s32.totalorder %s3261_s24, 0 }
   0xd   : > { %p88_p4 = por %p87_p1, %p86_p0  ;;  %p2424_p5 = scmp.ge.s32.totalorder %s3187_s23, 1 }
   0xe   : > { %p3272_p6 = por %p4650_p3, %p92_p2  ;;  %p176_p7 = scmp.lt.s32.totalorder %s3187_s23, 4 }
   0xf   : > { %s3189_s28 = smov [#allocation3]   ;;  %p2704_p10 = scmp.lt.s32.totalorder %s3187_s23, 3 }
  0x10   : > { %s4689_s26 = scalar_select %p3272_p6, 1, 0 }
  0x11   : > { %p3277_p8 = pnand %p2424_p5, %p176_p7  ;;  %s188_s29 = sshll.u32 %s3189_s28, 4  ;;  %s189_s29 = int_to_ptr.vmem [resolvable:$true] %s188_s29 }
  0x12   : > { %p3290_p12 = pnand %p2704_p10, %p88_p4  ;;  %s30_s7 = sadd.s32 1, %s3183_s22 }
  0x13   : > { %s4690_s27 = scalar_select %p3277_p8, 1, 0 }
  0x14   : > { %p2685_p9 = pneg %p3277_p8  ;;  %s4693_s0 = sld [smem:[#allocation34_spill]] }
  0x15   : > { %s4692_s6 = scalar_select %p3290_p12, 1, 0 }
  0x16   : > { %p3286_p11 = pnand %p2685_p9, %p4650_p3 }
  0x18   : > { %s4691_s30 = scalar_select %p3286_p11, 1, 0 }
  0x19   : > { %p4657_p0 = pneg %p3286_p11 }
  0x1a   : > { %s2953_s10 = scalar_lea.hbm %s4693_s0, 4096 }
  0x1b   : > { %p2954_p13 = scmp.ne.s32.totalorder %s4693_s0, %s2953_s10  ;;  %p2960_p4 = scmp.lt.u32.totalorder %s2953_s10, %s4693_s0 }
  0x1d   : > { %p2956_p1 = pnand %p4657_p0, %p2954_p13 }
  0x1f   : > { %p2957_p2 = pneg %p2956_p1 }
  0x21   : > { %p2962_p5 = pnand %p2960_p4, %p2957_p2 }
  0x23   : > { %2965 = shalt.err (!%p2962_p5)
}
  0x24   : > { %s2966_s15 = scalar_lea.vmem %s189_s29, 4096  ;;  %p2974_p3 = scmp.lt.s32.totalorder %s189_s29, %s189_s29 }
  0x25   : > { %p2967_p7 = scmp.ne.s32.totalorder %s189_s29, %s2966_s15  ;;  %p2975_p6 = scmp.lt.s32.totalorder %s2966_s15, %s2966_s15 }
  0x27   : > { %p2969_p9 = pnand %p2967_p7, %p4657_p0  ;;  %p2976_p8 = por %p2975_p6, %p2974_p3 }
  0x29   : > { %p2970_p10 = pneg %p2969_p9 }
  0x2b   : > { %p2977_p12 = pnand %p2976_p8, %p2970_p10 }
  0x2d   : > { %2980 = shalt.err (!%p2977_p12)
}
  0x2e   : > { %s4655_s16 = smov 128   ;;  %s4660_s17 = smov 8  }
  0x2f   : > { %2688 = dma.hbm_to_vmem [thread:$0]  (!%p3286_p11), %s4693_s0, 4096, %s189_s29, [#allocation4], %s4655_s16, %s4655_s16, %s4660_s17  }
  0x30   : > { %p32_p3 = scmp.ge.s32.totalorder %s30_s7, 3  ;;  %s215_s8 = sand.u32 1, %s3187_s23  }
  0x31   : > { %s217_s9 = sand.u32 1, %s3175_s20   ;;  %s2494_s12 = sshll.u32 %s3183_s22, 10 }
  0x32   : > { %s4796_s7 = smov (%p32_p3, %s30_s7), 0  ;;  %s2428_s11 = sshll.u32 %s217_s9, 6 }
  0x33   : > { %4694 = sst [smem:[#allocation16_spill]] %s4796_s7  ;;  %s76_s10 = ssub.s32 %s3183_s22, %s4796_s7 }
  0x34   : > { %p77_p6 = scmp.eq.s32.totalorder %s76_s10, 0  ;;  %s4695_s2 = sld [smem:[#allocation35_spill]] }
  0x35   : > { %s219_s29 = scalar_lea.vmem [#allocation8], %s2428_s11  ;;  %s3339_s28 = sshll.u32 %s217_s9, 7 }
  0x36   : > { %s3330_s13 = scalar_select %p77_p6, %s3175_s20, %s79_s25  }
  0x37   : > { %s226_s18 = sshll.u32 %s219_s29, 4  ;;  %s3341_s10 = scalar_lea.sflag [#allocation4], %s215_s8  ;;  %s3337_s18 = int_to_ptr.vmem [resolvable:$true] %s226_s18 }
  0x38   : > { %p4696_p12 = scmp.ne.s32.totalorder %s4692_s6, 0 }
  0x3a   : > { %s3335_s5 = scalar_lea.hbm %s4695_s2, %s2494_s12  ;;  %p3347_p13 = pneg %p4696_p12 }
  0x3b   : > { %s2981_s16 = scalar_lea.hbm %s3335_s5, 1024  ;;  %s2986_s14 = scalar_lea.hbm %s4695_s2, 3072 }
  0x3c   : > { %p2982_p8 = scmp.ne.s32.totalorder %s3335_s5, %s2981_s16  ;;  %p2987_p4 = scmp.lt.u32.totalorder %s3335_s5, %s4695_s2 }
  0x3d   : > { %s4697_s25 = scalar_select %p3347_p13, 1, 0 }
  0x3e   : > { %p2984_p1 = pnand %p3347_p13, %p2982_p8  ;;  %p2988_p5 = scmp.lt.u32.totalorder %s2986_s14, %s2981_s16 }
  0x3f   : > { %p2990_p9 = scmp.lt.u32.totalorder %s2981_s16, %s3335_s5 }
  0x40   : > { %p2985_p2 = pneg %p2984_p1  ;;  %p2989_p7 = por %p2988_p5, %p2987_p4 }
  0x42   : > { %p2991_p10 = por %p2990_p9, %p2989_p7 }
  0x44   : > { %p2992_p3 = pnand %p2991_p10, %p2985_p2 }
  0x46   : > { %2995 = shalt.err (!%p2992_p3)
}
  0x47   : > { %s2996_s8 = scalar_lea.vmem %s3337_s18, 1024  ;;  %s3192_s29 = smov [#allocation8]  }
  0x48   : > { %p2997_p6 = scmp.ne.s32.totalorder %s3337_s18, %s2996_s8  ;;  %s3001_s12 = sshll.u32 %s3192_s29, 4  ;;  %s3002_s12 = int_to_ptr.vmem [resolvable:$false] %s3001_s12 }
  0x49   : > { %s3003_s11 = scalar_lea.vmem %s3002_s12, 2048  ;;  %p3004_p0 = scmp.lt.s32.totalorder %s3337_s18, %s3002_s12 }
  0x4a   : > { %p2999_p8 = pnand %p2997_p6, %p3347_p13  ;;  %p3005_p11 = scmp.lt.s32.totalorder %s3003_s11, %s2996_s8 }
  0x4c   : > { %p3000_p1 = pneg %p2999_p8  ;;  %p3006_p4 = por %p3005_p11, %p3004_p0 }
  0x4e   : > { %p3007_p5 = pnand %p3006_p4, %p3000_p1 }
  0x50   : > { %3010 = shalt.err (!%p3007_p5)
}
  0x51   : > { %s4662_s16 = smov 64   ;;  %s4663_s14 = smov 4  }
  0x52   : > { %2695 = dma.hbm_to_vmem [thread:$0]  (!%p4696_p12), %s3335_s5, 1024, %s3337_s18, %s3341_s10, %s4662_s16, %s4662_s16, %s4663_s14  }
  0x53   : > { %s2495_s15 = sshll.u32 %s3183_s22, 11  ;;  %s4698_s3 = sld [smem:[#allocation36_spill]] }
  0x54   : > { %s240_s12 = scalar_lea.vmem [#allocation9], %s3339_s28 }
  0x55   : > { %s247_s11 = sshll.u32 %s240_s12, 4  ;;  %s3383_s11 = int_to_ptr.vmem [resolvable:$true] %s247_s11 }
  0x59   : > { %s3380_s29 = scalar_lea.hbm %s4698_s3, %s2495_s15  ;;  %s3016_s16 = scalar_lea.hbm %s4698_s3, 6144 }
  0x5a   : > { %s3011_s17 = scalar_lea.hbm %s3380_s29, 2048  ;;  %p3017_p7 = scmp.lt.u32.totalorder %s3380_s29, %s4698_s3 }
  0x5b   : > { %p3012_p11 = scmp.ne.s32.totalorder %s3380_s29, %s3011_s17  ;;  %p3018_p9 = scmp.lt.u32.totalorder %s3016_s16, %s3011_s17 }
  0x5c   : > { %p3020_p3 = scmp.lt.u32.totalorder %s3011_s17, %s3380_s29 }
  0x5d   : > { %p3014_p0 = pnand %p3012_p11, %p3347_p13  ;;  %p3019_p10 = por %p3018_p9, %p3017_p7 }
  0x5f   : > { %p3015_p2 = pneg %p3014_p0  ;;  %p3021_p6 = por %p3020_p3, %p3019_p10 }
  0x61   : > { %p3022_p8 = pnand %p3021_p6, %p3015_p2 }
  0x63   : > { %3025 = shalt.err (!%p3022_p8)
}
  0x64   : > { %s3026_s12 = scalar_lea.vmem %s3383_s11, 2048  ;;  %s3195_s5 = smov [#allocation9]  }
  0x65   : > { %p3027_p1 = scmp.ne.s32.totalorder %s3383_s11, %s3026_s12  ;;  %s3031_s18 = sshll.u32 %s3195_s5, 4  ;;  %s3032_s18 = int_to_ptr.vmem [resolvable:$false] %s3031_s18 }
  0x66   : > { %s3033_s9 = scalar_lea.vmem %s3032_s18, 4096  ;;  %p3034_p11 = scmp.lt.s32.totalorder %s3383_s11, %s3032_s18 }
  0x67   : > { %p3029_p4 = pnand %p3027_p1, %p3347_p13  ;;  %p3035_p0 = scmp.lt.s32.totalorder %s3033_s9, %s3026_s12 }
  0x69   : > { %p3030_p5 = pneg %p3029_p4  ;;  %p3036_p7 = por %p3035_p0, %p3034_p11 }
  0x6b   : > { %p3037_p9 = pnand %p3036_p7, %p3030_p5 }
  0x6d   : > { %3040 = shalt.err (!%p3037_p9)
}
  0x6e   : > { %s4699_s17 = smov 8   ;;  %s4700_s16 = smov 128  }
  0x6f   : > { %2698 = dma.hbm_to_vmem [thread:$0]  (!%p4696_p12), %s3380_s29, 2048, %s3383_s11, %s3341_s10, %s4700_s16, %s4700_s16, %s4699_s17  }
  0x70   : > { %s3196_s8 = smov [#allocation6]   ;;  %s3415_s9 = scalar_lea.hbm %s4648_s4, %s2495_s15 }
  0x71   : > { %s201_s5 = sshll.u32 %s3196_s8, 4  ;;  %s3041_s2 = scalar_lea.hbm %s4645_s1, 2048  ;;  %s202_s5 = int_to_ptr.vmem [resolvable:$true] %s201_s5 }
  0x72   : > { %p3042_p2 = scmp.ne.s32.totalorder %s4645_s1, %s3041_s2  ;;  %p4701_p10 = scmp.ne.s32.totalorder %s4691_s30, 0 }
  0x73   : > { %p3048_p1 = scmp.lt.u32.totalorder %s3041_s2, %s4645_s1 }
  0x74   : > { %p4702_p3 = pneg %p4701_p10 }
  0x76   : > { %p3044_p6 = pnand %p3042_p2, %p4702_p3 }
  0x78   : > { %p3045_p8 = pneg %p3044_p6 }
  0x7a   : > { %p3050_p4 = pnand %p3048_p1, %p3045_p8 }
  0x7c   : > { %3053 = shalt.err (!%p3050_p4)
}
  0x7d   : > { %s3054_s15 = scalar_lea.vmem %s202_s5, 2048  ;;  %p4703_p11 = pmov %p4702_p3 }
  0x7e   : > { %p3055_p5 = scmp.ne.s32.totalorder %s202_s5, %s3054_s15  ;;  %p3062_p9 = scmp.lt.s32.totalorder %s202_s5, %s202_s5 }
  0x7f   : > { %p3063_p12 = scmp.lt.s32.totalorder %s3054_s15, %s3054_s15 }
  0x80   : > { %p3057_p0 = pnand %p3055_p5, %p4703_p11 }
  0x81   : > { %p3064_p13 = por %p3063_p12, %p3062_p9 }
  0x82   : > { %p3058_p7 = pneg %p3057_p0 }
  0x84   : > { %p3065_p2 = pnand %p3064_p13, %p3058_p7 }
  0x86   : > { %3068 = shalt.err (!%p3065_p2)
}
  0x87   : > { %s4704_s0 = smov 4   ;;  %s4705_s3 = smov 64  }
  0x88   : > { %2691 = dma.hbm_to_vmem [thread:$0]  (!%p4701_p10), %s4645_s1, 2048, %s202_s5, [#allocation7], %s4705_s3, %s4705_s3, %s4704_s0  }
  0x89   : > { %s261_s14 = scalar_lea.vmem [#allocation10], %s3339_s28  ;;  %s3069_s18 = scalar_lea.hbm %s3415_s9, 2048 }
  0x8a   : > { %s268_s8 = sshll.u32 %s261_s14, 4  ;;  %p3070_p12 = scmp.ne.s32.totalorder %s3415_s9, %s3069_s18  ;;  %s3441_s8 = int_to_ptr.vmem [resolvable:$true] %s268_s8 }
  0x8b   : > { %p4706_p13 = scmp.ne.s32.totalorder %s4697_s25, 0  ;;  %s3074_s29 = scalar_lea.hbm %s4648_s4, 6144 }
  0x8c   : > { %p3075_p8 = scmp.lt.u32.totalorder %s3415_s9, %s4648_s4  ;;  %p3076_p1 = scmp.lt.u32.totalorder %s3074_s29, %s3069_s18 }
  0x8d   : > { %p3072_p3 = pnand %p3070_p12, %p4706_p13  ;;  %p3078_p10 = scmp.lt.u32.totalorder %s3069_s18, %s3415_s9 }
  0x8e   : > { %p3077_p4 = por %p3076_p1, %p3075_p8 }
  0x8f   : > { %p3073_p6 = pneg %p3072_p3 }
  0x90   : > { %p3079_p5 = por %p3078_p10, %p3077_p4 }
  0x92   : > { %p3080_p11 = pnand %p3079_p5, %p3073_p6 }
  0x94   : > { %3083 = shalt.err (!%p3080_p11)
}
  0x95   : > { %s3084_s28 = scalar_lea.vmem %s3441_s8, 2048  ;;  %s3197_s5 = smov [#allocation10]  }
  0x96   : > { %p3085_p0 = scmp.ne.s32.totalorder %s3441_s8, %s3084_s28  ;;  %s3089_s0 = sshll.u32 %s3197_s5, 4  ;;  %s3090_s0 = int_to_ptr.vmem [resolvable:$false] %s3089_s0 }
  0x97   : > { %s3091_s3 = scalar_lea.vmem %s3090_s0, 4096  ;;  %p3092_p2 = scmp.lt.s32.totalorder %s3441_s8, %s3090_s0 }
  0x98   : > { %p3087_p7 = pnand %p3085_p0, %p4706_p13  ;;  %p3093_p12 = scmp.lt.s32.totalorder %s3091_s3, %s3084_s28 }
  0x9a   : > { %p3088_p9 = pneg %p3087_p7  ;;  %p3094_p3 = por %p3093_p12, %p3092_p2 }
  0x9c   : > { %p3095_p8 = pnand %p3094_p3, %p3088_p9 }
  0x9e   : > { %3098 = shalt.err (!%p3095_p8)
}
  0x9f   : > { %p4707_p6 = scmp.ne.s32.totalorder %s4692_s6, 0  ;;  %p4708_p13 = scmp.ne.s32.totalorder %s4690_s27, 0 }
  0xa1   : > { %2701 = dma.hbm_to_vmem [thread:$0]  (!%p4707_p6), %s3415_s9, 2048, %s3441_s8, %s3341_s10, %s4700_s16, %s4700_s16, %s4699_s17  }
  0xa2   : > { %280 = sbr.rel (%p4708_p13) target bundleno = 1266 (0x4f2), region = 40 }
  0xa9   : > { %p4709_p1 = scmp.eq.s32.totalorder %s3261_s24, 0 }
  0xab   : > { %3150 = dma.done.wait (%p4709_p1), [#allocation4], 4096   ;;  %p4710_p4 = pmov %p4709_p1 }
  0xac   : > { %p4711_p10 = pmov %p4709_p1 }
  0xad   : > { %3152 = vsyncadd (%p4710_p4), [#allocation4], 4294963200 }
  0xae   : > { %3154 = dma.done.wait (%p4711_p10), [#allocation7], 2048   ;;  %p4712_p5 = pmov %p4709_p1 }
  0xaf   : > { %s290_s6 = sand.u32 1, %s3261_s24   ;;  %s292_s10 = sand.u32 1, %s3171_s19  }
  0xb0   : > { %3156 = vsyncadd (%p4712_p5), [#allocation7], 4294965248  ;;  %s2440_s25 = sshll.u32 %s292_s10, 6  ;;  %s291_s27 = scalar_lea.sflag [#allocation4], %s290_s6 }
  0xb1   : > { %s3480_s17 = scalar_lea.vmem [#allocation8], %s2440_s25  ;;  %p4713_p11 = scmp.ne.s32.totalorder %s4689_s26, 0 }
  0xb3   : > { %3158 = dma.done.wait (%p4713_p11), %s291_s27, 5120  }
  0xb4   : > { %3160 = vsyncadd (%p4713_p11), %s291_s27, 4294962176  ;;  %s2441_s16 = sshll.u32 %s292_s10, 7  ;;  %p346_p0 = scmp.eq.s32.totalorder %s3179_s21, 0 }
  0xb5   : > { %s3487_s9 = scalar_lea.vmem [#allocation9], %s2441_s16  ;;  %s3489_s2 = scalar_lea.vmem [#allocation10], %s2441_s16  ;;  %v352_v0 = vld [vmem:[#allocation3] sm:$0xff] (%p346_p0)  ;;  %v353_v1 = vld [vmem:[#allocation3 + $0x8] sm:$0xff] (%p346_p0)  ;;  %v354_v2 = vld [vmem:[#allocation3 + $0x10] sm:$0xff] (%p346_p0) }
  0xb6   : > { %351 = sbr.rel (!%p346_p0) target bundleno = 196 (0xc4), region = 64  ;;  %v384_v3 = vpack.c.bf16 (%p346_p0), %v353_v1, %v352_v0  ;;  %v355_v4 = vld [vmem:[#allocation3 + $0x18] sm:$0xff] (%p346_p0)  ;;  %v356_v5 = vld [vmem:[#allocation3 + $0x20] sm:$0xff] (%p346_p0)  ;;  %v357_v6 = vld [vmem:[#allocation3 + $0x28] sm:$0xff] (%p346_p0) }
  0xb7   : > { %v385_v7 = vpack.c.bf16 (%p346_p0), %v355_v4, %v354_v2  ;;  %v386_v8 = vpack.c.bf16 (%p346_p0), %v357_v6, %v356_v5  ;;  %v358_v9 = vld [vmem:[#allocation3 + $0x30] sm:$0xff] (%p346_p0)  ;;  %v359_v10 = vld [vmem:[#allocation3 + $0x38] sm:$0xff] (%p346_p0)  ;;  %v360_v11 = vld [vmem:[#allocation3 + $0x40] sm:$0xff] (%p346_p0) }
  0xb8   : > { %400 = vst [vmem:[#allocation2] sm:$0xff] (%p346_p0), %v384_v3  ;;  %v387_v12 = vpack.c.bf16 (%p346_p0), %v359_v10, %v358_v9  ;;  %v361_v13 = vld [vmem:[#allocation3 + $0x48] sm:$0xff] (%p346_p0)  ;;  %v362_v14 = vld [vmem:[#allocation3 + $0x50] sm:$0xff] (%p346_p0)  ;;  %v363_v15 = vld [vmem:[#allocation3 + $0x58] sm:$0xff] (%p346_p0) }
  0xb9   : > { %401 = vst [vmem:[#allocation2 + $0x8] sm:$0xff] (%p346_p0), %v385_v7  ;;  %402 = vst [vmem:[#allocation2 + $0x10] sm:$0xff] (%p346_p0), %v386_v8  ;;  %v388_v16 = vpack.c.bf16 (%p346_p0), %v361_v13, %v360_v11  ;;  %v389_v17 = vpack.c.bf16 (%p346_p0), %v363_v15, %v362_v14  ;;  %v364_v18 = vld [vmem:[#allocation3 + $0x60] sm:$0xff] (%p346_p0)  ;;  %v365_v19 = vld [vmem:[#allocation3 + $0x68] sm:$0xff] (%p346_p0) }
  0xba   : > { %v366_v20 = vld [vmem:[#allocation3 + $0x70] sm:$0xff] (%p346_p0)  ;;  %403 = vst [vmem:[#allocation2 + $0x18] sm:$0xff] (%p346_p0), %v387_v12  ;;  %v390_v21 = vpack.c.bf16 (%p346_p0), %v365_v19, %v364_v18  ;;  %v367_v22 = vld [vmem:[#allocation3 + $0x78] sm:$0xff] (%p346_p0)  ;;  %v368_v23 = vld [vmem:[#allocation3 + $0x80] sm:$0xff] (%p346_p0) }
  0xbb   : > { %v369_v24 = vld [vmem:[#allocation3 + $0x88] sm:$0xff] (%p346_p0)  ;;  %404 = vst [vmem:[#allocation2 + $0x20] sm:$0xff] (%p346_p0), %v388_v16  ;;  %405 = vst [vmem:[#allocation2 + $0x28] sm:$0xff] (%p346_p0), %v389_v17  ;;  %v391_v25 = vpack.c.bf16 (%p346_p0), %v367_v22, %v366_v20  ;;  %v370_v27 = vld [vmem:[#allocation3 + $0x90] sm:$0xff] (%p346_p0) }
  0xbc   : > { %v392_v26 = vpack.c.bf16 (%p346_p0), %v369_v24, %v368_v23  ;;  %v371_v28 = vld [vmem:[#allocation3 + $0x98] sm:$0xff] (%p346_p0)  ;;  %v372_v29 = vld [vmem:[#allocation3 + $0xa0] sm:$0xff] (%p346_p0)  ;;  %406 = vst [vmem:[#allocation2 + $0x30] sm:$0xff] (%p346_p0), %v390_v21  ;;  %v373_v31 = vld [vmem:[#allocation3 + $0xa8] sm:$0xff] (%p346_p0) }
  0xbd   : > { %v393_v30 = vpack.c.bf16 %v371_v28, %v370_v27  ;;  %v374_v32 = vld [vmem:[#allocation3 + $0xb0] sm:$0xff]  ;;  %v375_v33 = vld [vmem:[#allocation3 + $0xb8] sm:$0xff]  ;;  %407 = vst [vmem:[#allocation2 + $0x38] sm:$0xff] %v391_v25  ;;  %v394_v34 = vpack.c.bf16 %v373_v31, %v372_v29  ;;  %v376_v36 = vld [vmem:[#allocation3 + $0xc0] sm:$0xff] }
  0xbe   : > { %408 = vst [vmem:[#allocation2 + $0x40] sm:$0xff] %v392_v26  ;;  %v395_v35 = vpack.c.bf16 %v375_v33, %v374_v32  ;;  %v377_v37 = vld [vmem:[#allocation3 + $0xc8] sm:$0xff]  ;;  %v378_v38 = vld [vmem:[#allocation3 + $0xd0] sm:$0xff]  ;;  %v379_v40 = vld [vmem:[#allocation3 + $0xd8] sm:$0xff] }
  0xbf   : > { %409 = vst [vmem:[#allocation2 + $0x48] sm:$0xff] %v393_v30  ;;  %v396_v39 = vpack.c.bf16 %v377_v37, %v376_v36  ;;  %v380_v41 = vld [vmem:[#allocation3 + $0xe0] sm:$0xff]  ;;  %v381_v42 = vld [vmem:[#allocation3 + $0xe8] sm:$0xff]  ;;  %410 = vst [vmem:[#allocation2 + $0x50] sm:$0xff] %v394_v34  ;;  %v397_v43 = vpack.c.bf16 %v379_v40, %v378_v38 }
  0xc0   : > { %411 = vst [vmem:[#allocation2 + $0x58] sm:$0xff] %v395_v35  ;;  %v398_v44 = vpack.c.bf16 %v381_v42, %v380_v41  ;;  %v382_v45 = vld [vmem:[#allocation3 + $0xf0] sm:$0xff]  ;;  %v383_v46 = vld [vmem:[#allocation3 + $0xf8] sm:$0xff] }
  0xc1   : > { %412 = vst [vmem:[#allocation2 + $0x60] sm:$0xff] %v396_v39  ;;  %v399_v47 = vpack.c.bf16 %v383_v46, %v382_v45  ;;  %413 = vst [vmem:[#allocation2 + $0x68] sm:$0xff] %v397_v43 }
  0xc2   : > { %414 = vst [vmem:[#allocation2 + $0x70] sm:$0xff] %v398_v44 }
  0xc3   : > { %415 = vst [vmem:[#allocation2 + $0x78] sm:$0xff] %v399_v47 }
  0xc4 PF: > { %p416_p7 = scmp.lt.s32.totalorder %s3179_s21, 0  ;;  %s417_s26 = ssub.s32 0, %s3179_s21  ;;  %v2769_v48 = vld [vmem:[#allocation6] sm:$0xff]   ;;  %v2786_v54 = vld [vmem:[%s3480_s17 + $0x8] sm:$0xff]   ;;  %v2787_v56 = vld [vmem:[%s3480_s17 + $0x10] sm:$0xff]  }
  0xc5   : > { %s2444_s7 = smin.u32 %s3179_s21, %s417_s26  ;;  %2571 = vmatprep.mubr.bf16.mxu1 %v2769_v48  ;;  %v2785_v53 = vld [vmem:[%s3480_s17] sm:$0xff]   ;;  %v2788_v58 = vld [vmem:[%s3480_s17 + $0x18] sm:$0xff]   ;;  %v2790_v62 = vld [vmem:[%s3480_s17 + $0x28] sm:$0xff]   ;;  %p2473_p2 = scmp.ne.s32.totalorder %s3179_s21, 2 }
  0xc6   : > { %s419_s14 = sand.u32 1, %s2444_s7   ;;  %2619 = vmatprep.subr.bf16.mxu0 %v2785_v53  ;;  %v2789_v60 = vld [vmem:[%s3480_s17 + $0x20] sm:$0xff]   ;;  %v2770_v0 = vld [vmem:[#allocation6 + $0x8] sm:$0xff]   ;;  %v2771_v1 = vld [vmem:[#allocation6 + $0x10] sm:$0xff]  }
  0xc7   : > { %s420_s8 = ssub.s32 0, %s419_s14  ;;  %2620 = vmatpush3.bf16.msra.mxu0 %v2785_v53  ;;  %v2791_v2 = vld [vmem:[%s3480_s17 + $0x30] sm:$0xff]   ;;  %v2772_v5 = vld [vmem:[#allocation6 + $0x18] sm:$0xff]   ;;  %v2773_v6 = vld [vmem:[#allocation6 + $0x20] sm:$0xff]  }
  0xc8   : > { %s4798_s8 = smov (!%p416_p7, %s420_s8), %s419_s14  ;;  %2621 = vmatprep.subr.bf16.mxu0 %v2786_v54  ;;  %v2774_v9 = vld [vmem:[#allocation6 + $0x28] sm:$0xff]   ;;  %v2775_v10 = vld [vmem:[#allocation6 + $0x30] sm:$0xff]   ;;  %v2776_v13 = vld [vmem:[#allocation6 + $0x38] sm:$0xff]  }
  0xc9   : > { %p2446_p9 = scmp.lt.s32.totalorder %s4798_s8, 0  ;;  %s426_s18 = sadd.s32 2, %s4798_s8  ;;  %v2777_v14 = vld [vmem:[#allocation6 + $0x40] sm:$0xff]   ;;  %v2778_v16 = vld [vmem:[#allocation6 + $0x48] sm:$0xff]   ;;  %v2779_v17 = vld [vmem:[#allocation6 + $0x50] sm:$0xff]  }
  0xca   : > { %v2780_v18 = vld [vmem:[#allocation6 + $0x58] sm:$0xff]   ;;  %v2781_v19 = vld [vmem:[#allocation6 + $0x60] sm:$0xff]   ;;  %v2782_v20 = vld [vmem:[#allocation6 + $0x68] sm:$0xff]  }
  0xcb   : > { %s4800_s18 = smov (!%p2446_p9, %s426_s18), %s4798_s8  ;;  %2622 = vmatpush3.bf16.msra.mxu0 %v2786_v54  ;;  %v2783_v21 = vld [vmem:[#allocation6 + $0x70] sm:$0xff]   ;;  %v2784_v22 = vld [vmem:[#allocation6 + $0x78] sm:$0xff]  }
  0xcc   : > { %s2498_s30 = sshll.u32 %s4800_s18, 7  ;;  %2623 = vmatprep.subr.bf16.mxu0 %v2787_v56  ;;  %v2792_v23 = vld [vmem:[%s3480_s17 + $0x38] sm:$0xff]  }
  0xcd   : > { %s3497_s12 = scalar_lea.vmem [#allocation2], %s2498_s30 }
  0xce   : > { %v431_v49 = vld [vmem:[%s3497_s12] sm:$0xff]  ;;  %v432_v50 = vld [vmem:[%s3497_s12 + $0x8] sm:$0xff]  ;;  %v433_v51 = vld [vmem:[%s3497_s12 + $0x10] sm:$0xff] }
  0xcf   : > { %2555 = vmatprep.subr.bf16.mxu1 %v431_v49  ;;  %v434_v52 = vld [vmem:[%s3497_s12 + $0x18] sm:$0xff]  ;;  %v435_v55 = vld [vmem:[%s3497_s12 + $0x20] sm:$0xff]  ;;  %v436_v57 = vld [vmem:[%s3497_s12 + $0x28] sm:$0xff]  ;;  %2624 = vmatpush3.bf16.msra.mxu0 %v2787_v56 }
  0xd0   : > { %2556 = vmatpush3.bf16.msra.mxu1 %v431_v49  ;;  %v437_v59 = vld [vmem:[%s3497_s12 + $0x30] sm:$0xff]  ;;  %2625 = vmatprep.subr.bf16.mxu0 %v2788_v58  ;;  %v438_v61 = vld [vmem:[%s3497_s12 + $0x38] sm:$0xff]  ;;  %v439_v63 = vld [vmem:[%s3497_s12 + $0x40] sm:$0xff] }
  0xd1   : > { %2557 = vmatprep.subr.bf16.mxu1 %v432_v50  ;;  %v440_v3 = vld [vmem:[%s3497_s12 + $0x48] sm:$0xff]  ;;  %v441_v4 = vld [vmem:[%s3497_s12 + $0x50] sm:$0xff]  ;;  %v442_v7 = vld [vmem:[%s3497_s12 + $0x58] sm:$0xff] }
  0xd2   : > { %v443_v8 = vld [vmem:[%s3497_s12 + $0x60] sm:$0xff]  ;;  %v444_v11 = vld [vmem:[%s3497_s12 + $0x68] sm:$0xff]  ;;  %v445_v12 = vld [vmem:[%s3497_s12 + $0x70] sm:$0xff] }
  0xd3   : > { %2626 = vmatpush3.bf16.msra.mxu0 %v2788_v58  ;;  %v446_v15 = vld [vmem:[%s3497_s12 + $0x78] sm:$0xff] }
  0xd4   : > { %2558 = vmatpush3.bf16.msra.mxu1 %v432_v50  ;;  %2627 = vmatprep.subr.bf16.mxu0 %v2789_v60 }
  0xd5   : > { %2559 = vmatprep.subr.bf16.mxu1 %v433_v51 }
  0xd7   : > { %2628 = vmatpush3.bf16.msra.mxu0 %v2789_v60 }
  0xd8   : > { %2560 = vmatpush3.bf16.msra.mxu1 %v433_v51  ;;  %2629 = vmatprep.subr.bf16.mxu0 %v2790_v62 }
  0xd9   : > { %2561 = vmatprep.subr.bf16.mxu1 %v434_v52 }
  0xdb   : > { %2630 = vmatpush3.bf16.msra.mxu0 %v2790_v62 }
  0xdc   : > { %2562 = vmatpush3.bf16.msra.mxu1 %v434_v52  ;;  %2631 = vmatprep.subr.bf16.mxu0 %v2791_v2 }
  0xdd   : > { %2563 = vmatprep.subr.bf16.mxu1 %v435_v55 }
  0xdf   : > { %2632 = vmatpush3.bf16.msra.mxu0 %v2791_v2 }
  0xe0   : > { %2564 = vmatpush3.bf16.msra.mxu1 %v435_v55  ;;  %2633 = vmatprep.subr.bf16.mxu0 %v2792_v23 }
  0xe1   : > { %2565 = vmatprep.subr.bf16.mxu1 %v436_v57 }
  0xe3   : > { %2634 = vmatpush3.bf16.msra.mxu0 %v2792_v23 }
  0xe4   : > { %2566 = vmatpush3.bf16.msra.mxu1 %v436_v57 }
  0xe5   : > { %2567 = vmatprep.subr.bf16.mxu1 %v437_v59 }
  0xe8   : > { %2568 = vmatpush3.bf16.msra.mxu1 %v437_v59 }
  0xe9   : > { %2569 = vmatprep.subr.bf16.mxu1 %v438_v61 }
  0xec   : > { %2570 = vmatpush3.bf16.msra.mxu1 %v438_v61 }
  0xed   : > { %2587 = vmatprep.subr.bf16.mxu1 %v439_v63 }
  0xef   : > { %2572 = vmatmul.mubr.bf16.vlgmr.msra.gmra.mrb[0].mxu1 %v2770_v0 }
  0xf0   : > { %2575 = vmatprep.mubr.bf16.mxu1 %v2771_v1  ;;  %2588 = vmatpush3.bf16.msra.mxu1 %v439_v63 }
  0xf1   : > { %2589 = vmatprep.subr.bf16.mxu1 %v440_v3 }
  0xf4   : > { %2590 = vmatpush3.bf16.msra.mxu1 %v440_v3 }
  0xf5   : > { %2591 = vmatprep.subr.bf16.mxu1 %v441_v4 }
  0xf7   : > { %2576 = vmatmul.mubr.bf16.gmra.mrb[4].mxu1 %v2772_v5 }
  0xf8   : > { %2579 = vmatprep.mubr.bf16.mxu1 %v2773_v6  ;;  %2592 = vmatpush3.bf16.msra.mxu1 %v441_v4 }
  0xf9   : > { %2593 = vmatprep.subr.bf16.mxu1 %v442_v7 }
  0xfc   : > { %2594 = vmatpush3.bf16.msra.mxu1 %v442_v7 }
  0xfd   : > { %2595 = vmatprep.subr.bf16.mxu1 %v443_v8 }
  0xff   : > { %2580 = vmatmul.mubr.bf16.gmra.mrb[8].mxu1 %v2774_v9 }
 0x100   : > { %2583 = vmatprep.mubr.bf16.mxu1 %v2775_v10  ;;  %2596 = vmatpush3.bf16.msra.mxu1 %v443_v8 }
 0x101   : > { %2597 = vmatprep.subr.bf16.mxu1 %v444_v11 }
 0x104   : > { %2598 = vmatpush3.bf16.msra.mxu1 %v444_v11 }
 0x105   : > { %2599 = vmatprep.subr.bf16.mxu1 %v445_v12 }
 0x107   : > { %2584 = vmatmul.mubr.bf16.gmra.mrb[12].mxu1 %v2776_v13 }
 0x108   : > { %2600 = vmatpush3.bf16.msra.mxu1 %v445_v12  ;;  %2603 = vmatprep.mubr.bf16.mxu1 %v2777_v14 }
 0x109   : > { %2601 = vmatprep.subr.bf16.mxu1 %v446_v15 }
 0x10c   : > { %2602 = vmatpush3.bf16.msra.mxu1 %v446_v15 }
 0x10f   : > { %2604 = vmatmul.mubr.bf16.vlgmr.msra.gmra.mrb[16].mxu1 %v2778_v16 }
 0x110   : > { %2607 = vmatprep.mubr.bf16.mxu1 %v2779_v17 }
 0x117   : > { %2608 = vmatmul.mubr.bf16.gmra.mrb[20].mxu1 %v2780_v18 }
 0x118   : > { %2611 = vmatprep.mubr.bf16.mxu1 %v2781_v19 }
 0x11f   : > { %2612 = vmatmul.mubr.bf16.gmra.mrb[24].mxu1 %v2782_v20 }
 0x120   : > { %2615 = vmatprep.mubr.bf16.mxu1 %v2783_v21 }
 0x127   : > { %2616 = vmatmul.mubr.bf16.gmra.mrb[28].mxu1 %v2784_v22 }
 0x1c2   : > { %v2573_v24 = vpop.f32.mrb[0].mxu1 }
 0x1c3   : > { %v565_v25 = vpop.f32.mrb[1].mxu1 }
 0x1c4   : > { %v2574_v26 = vpop.f32.mrb[2].mxu1 }
 0x1c5   : > { %v790_v27 = vpack.c.bf16 %v2574_v26, %v2573_v24  ;;  %v568_v28 = vpop.f32.mrb[3].mxu1 }
 0x1c6   : > { %v789_v29 = vpack.c.bf16 %v568_v28, %v565_v25 }
 0x1c8   : > { %2635 = vmatprep.mubr.bf16.mxu0 %v789_v29 }
 0x1c9   : > { %2636 = vmatmul.mubr.bf16.vlgmr.msra.gmra.mrb[0].mxu0 %v790_v27 }
 0x1ca   : > { %v2577_v30 = vpop.f32.mrb[4].mxu1 }
 0x1cb   : > { %v581_v31 = vpop.f32.mrb[5].mxu1 }
 0x1cc   : > { %v2578_v32 = vpop.f32.mrb[6].mxu1 }
 0x1cd   : > { %v792_v33 = vpack.c.bf16 %v2578_v32, %v2577_v30  ;;  %v584_v34 = vpop.f32.mrb[7].mxu1 }
 0x1ce   : > { %v791_v35 = vpack.c.bf16 %v584_v34, %v581_v31 }
 0x1d0   : > { %2639 = vmatprep.mubr.bf16.mxu0 %v791_v35 }
 0x1d1   : > { %2640 = vmatmul.mubr.bf16.gmra.mrb[4].mxu0 %v792_v33 }
 0x1d2   : > { %v2581_v36 = vpop.f32.mrb[8].mxu1 }
 0x1d3   : > { %v597_v37 = vpop.f32.mrb[9].mxu1 }
 0x1d4   : > { %v2582_v38 = vpop.f32.mrb[10].mxu1 }
 0x1d5   : > { %v794_v39 = vpack.c.bf16 %v2582_v38, %v2581_v36  ;;  %v600_v40 = vpop.f32.mrb[11].mxu1 }
 0x1d6   : > { %v793_v41 = vpack.c.bf16 %v600_v40, %v597_v37 }
 0x1d8   : > { %2643 = vmatprep.mubr.bf16.mxu0 %v793_v41 }
 0x1d9   : > { %2644 = vmatmul.mubr.bf16.gmra.mrb[8].mxu0 %v794_v39 }
 0x1da   : > { %v2585_v42 = vpop.f32.mrb[12].mxu1 }
 0x1db   : > { %v613_v43 = vpop.f32.mrb[13].mxu1 }
 0x1dc   : > { %v2586_v44 = vpop.f32.mrb[14].mxu1 }
 0x1dd   : > { %v796_v45 = vpack.c.bf16 %v2586_v44, %v2585_v42  ;;  %v616_v46 = vpop.f32.mrb[15].mxu1 }
 0x1de   : > { %v795_v47 = vpack.c.bf16 %v616_v46, %v613_v43 }
 0x1e0   : > { %2647 = vmatprep.mubr.bf16.mxu0 %v795_v47 }
 0x1e1   : > { %2648 = vmatmul.mubr.bf16.gmra.mrb[12].mxu0 %v796_v45 }
 0x1e2   : > { %v2605_v48 = vpop.f32.mrb[16].mxu1 }
 0x1e3   : > { %v710_v49 = vpop.f32.mrb[17].mxu1 }
 0x1e4   : > { %v2606_v50 = vpop.f32.mrb[18].mxu1 }
 0x1e5   : > { %v798_v51 = vpack.c.bf16 %v2606_v50, %v2605_v48  ;;  %v713_v52 = vpop.f32.mrb[19].mxu1 }
 0x1e6   : > { %v797_v53 = vpack.c.bf16 %v713_v52, %v710_v49 }
 0x1e8   : > { %2651 = vmatprep.mubr.bf16.mxu0 %v797_v53 }
 0x1e9   : > { %2652 = vmatmul.mubr.bf16.gmra.mrb[16].mxu0 %v798_v51 }
 0x1ea   : > { %v2609_v54 = vpop.f32.mrb[20].mxu1 }
 0x1eb   : > { %v726_v55 = vpop.f32.mrb[21].mxu1 }
 0x1ec   : > { %v2610_v56 = vpop.f32.mrb[22].mxu1 }
 0x1ed   : > { %v800_v57 = vpack.c.bf16 %v2610_v56, %v2609_v54  ;;  %v729_v58 = vpop.f32.mrb[23].mxu1 }
 0x1ee   : > { %v799_v59 = vpack.c.bf16 %v729_v58, %v726_v55 }
 0x1f0   : > { %2655 = vmatprep.mubr.bf16.mxu0 %v799_v59 }
 0x1f1   : > { %2656 = vmatmul.mubr.bf16.gmra.mrb[20].mxu0 %v800_v57 }
 0x1f2   : > { %v2613_v60 = vpop.f32.mrb[24].mxu1 }
 0x1f3   : > { %v742_v61 = vpop.f32.mrb[25].mxu1 }
 0x1f4   : > { %v2614_v62 = vpop.f32.mrb[26].mxu1 }
 0x1f5   : > { %v802_v63 = vpack.c.bf16 %v2614_v62, %v2613_v60  ;;  %v745_v0 = vpop.f32.mrb[27].mxu1 }
 0x1f6   : > { %v801_v1 = vpack.c.bf16 %v745_v0, %v742_v61 }
 0x1f8   : > { %2659 = vmatprep.mubr.bf16.mxu0 %v801_v1 }
 0x1f9   : > { %2660 = vmatmul.mubr.bf16.gmra.mrb[24].mxu0 %v802_v63 }
 0x1fa   : > { %v2617_v2 = vpop.f32.mrb[28].mxu1 }
 0x1fb   : > { %v758_v3 = vpop.f32.mrb[29].mxu1 }
 0x1fc   : > { %v2618_v4 = vpop.f32.mrb[30].mxu1 }
 0x1fd   : > { %v804_v5 = vpack.c.bf16 %v2618_v4, %v2617_v2  ;;  %v761_v6 = vpop.f32.mrb[31].mxu1  ;;  %v3198_v4 = vmov 0  }
 0x1fe   : > { %v803_v7 = vpack.c.bf16 %v761_v6, %v758_v3  ;;  %2767 = vset.pattern.permute.xlu1 %v3198_v4  ;;  %2768 = vset.pattern.permute.xlu0 %v3198_v4 }
 0x200   : > { %2663 = vmatprep.mubr.bf16.mxu0 %v803_v7 }
 0x201   : > { %2664 = vmatmul.mubr.bf16.gmra.mrb[28].mxu0 %v804_v5 }
 0x29c   : > { %v3523_v8 = vpop.f32.mrb[0].mxu0 }
 0x29d   : > { %1018 = vadd.xlane.f32.xlu1 %v3523_v8  ;;  %v3526_v9 = vpop.f32.mrb[1].mxu0  ;;  %v1096_v12 = vmul.f32 %v3523_v8, %v3523_v8 }
 0x29e   : > { %1014 = vadd.xlane.f32.xlu0 %v3526_v9  ;;  %v3529_v10 = vpop.f32.mrb[2].mxu0  ;;  %v1094_v19 = vmul.f32 %v3526_v9, %v3526_v9 }
 0x29f   : > { %v3531_v11 = vpop.f32.mrb[3].mxu0  ;;  %v1097_v13 = vmul.f32 %v3529_v10, %v3529_v10 }
 0x2a0   : > { %v1095_v17 = vmul.f32 %v3531_v11, %v3531_v11 }
 0x2a1   : > { %1020 = vadd.xlane.f32.xlu1 %v3529_v10 }
 0x2a2   : > { %1130 = vadd.xlane.f32.xlu0 %v1096_v12 }
 0x2a4   : > { %v3538_v14 = vpop.f32.mrb[4].mxu0 }
 0x2a5   : > { %1132 = vadd.xlane.f32.xlu1 %v1097_v13  ;;  %v3540_v15 = vpop.f32.mrb[5].mxu0  ;;  %v1100_v25 = vmul.f32 %v3538_v14, %v3538_v14 }
 0x2a6   : > { %4714 = vst [vmem:[#allocation17_spill] sm:$0xff] %v3540_v15  ;;  %1016 = vadd.xlane.f32.xlu0 %v3531_v11  ;;  %v3543_v16 = vpop.f32.mrb[6].mxu0  ;;  %v1098_v31 = vmul.f32 %v3540_v15, %v3540_v15 }
 0x2a7   : > { %v3547_v18 = vpop.f32.mrb[7].mxu0  ;;  %v1101_v24 = vmul.f32 %v3543_v16, %v3543_v16 }
 0x2a8   : > { %v1099_v29 = vmul.f32 %v3547_v18, %v3547_v18 }
 0x2a9   : > { %1128 = vadd.xlane.f32.xlu1 %v1095_v17 }
 0x2aa   : > { %1126 = vadd.xlane.f32.xlu0 %v1094_v19 }
 0x2ac   : > { %v3551_v20 = vpop.f32.mrb[8].mxu0 }
 0x2ad   : > { %4715 = vst [vmem:[#allocation18_spill] sm:$0xff] %v3551_v20  ;;  %1028 = vadd.xlane.f32.xlu1 %v3543_v16  ;;  %v3554_v21 = vpop.f32.mrb[9].mxu0  ;;  %v1104_v37 = vmul.f32 %v3551_v20, %v3551_v20 }
 0x2ae   : > { %4716 = vst [vmem:[#allocation19_spill] sm:$0xff] %v3554_v21  ;;  %1026 = vadd.xlane.f32.xlu0 %v3538_v14  ;;  %v3557_v22 = vpop.f32.mrb[10].mxu0  ;;  %v1102_v43 = vmul.f32 %v3554_v21, %v3554_v21 }
 0x2af   : > { %v3559_v23 = vpop.f32.mrb[11].mxu0  ;;  %v1105_v36 = vmul.f32 %v3557_v22, %v3557_v22 }
 0x2b0   : > { %4717 = vst [vmem:[#allocation20_spill] sm:$0xff] %v3559_v23  ;;  %v1103_v41 = vmul.f32 %v3559_v23, %v3559_v23 }
 0x2b1   : > { %1024 = vadd.xlane.f32.xlu1 %v3547_v18 }
 0x2b2   : > { %1022 = vadd.xlane.f32.xlu0 %v3540_v15 }
 0x2b4   : > { %v3567_v26 = vpop.f32.mrb[12].mxu0 }
 0x2b5   : > { %4718 = vst [vmem:[#allocation21_spill] sm:$0xff] %v3567_v26  ;;  %1140 = vadd.xlane.f32.xlu1 %v1101_v24  ;;  %v3569_v27 = vpop.f32.mrb[13].mxu0  ;;  %v1108_v49 = vmul.f32 %v3567_v26, %v3567_v26 }
 0x2b6   : > { %4719 = vst [vmem:[#allocation22_spill] sm:$0xff] %v3569_v27  ;;  %1138 = vadd.xlane.f32.xlu0 %v1100_v25  ;;  %v3571_v28 = vpop.f32.mrb[14].mxu0  ;;  %v1106_v55 = vmul.f32 %v3569_v27, %v3569_v27 }
 0x2b7   : > { %4720 = vst [vmem:[#allocation23_spill] sm:$0xff] %v3571_v28  ;;  %v3575_v30 = vpop.f32.mrb[15].mxu0  ;;  %v1109_v48 = vmul.f32 %v3571_v28, %v3571_v28 }
 0x2b8   : > { %4721 = vst [vmem:[#allocation24_spill] sm:$0xff] %v3575_v30  ;;  %v1107_v53 = vmul.f32 %v3575_v30, %v3575_v30 }
 0x2b9   : > { %1136 = vadd.xlane.f32.xlu1 %v1099_v29 }
 0x2ba   : > { %1134 = vadd.xlane.f32.xlu0 %v1098_v31 }
 0x2bc   : > { %v3579_v32 = vpop.f32.mrb[16].mxu0 }
 0x2bd   : > { %1036 = vadd.xlane.f32.xlu1 %v3557_v22  ;;  %v3582_v33 = vpop.f32.mrb[17].mxu0  ;;  %v1112_v57 = vmul.f32 %v3579_v32, %v3579_v32 }
 0x2be   : > { %1034 = vadd.xlane.f32.xlu0 %v3551_v20  ;;  %v3585_v34 = vpop.f32.mrb[18].mxu0  ;;  %v1110_v59 = vmul.f32 %v3582_v33, %v3582_v33 }
 0x2bf   : > { %v3587_v35 = vpop.f32.mrb[19].mxu0  ;;  %v1113_v56 = vmul.f32 %v3585_v34, %v3585_v34 }
 0x2c0   : > { %v1111_v58 = vmul.f32 %v3587_v35, %v3587_v35 }
 0x2c1   : > { %1032 = vadd.xlane.f32.xlu1 %v3559_v23 }
 0x2c2   : > { %1030 = vadd.xlane.f32.xlu0 %v3554_v21 }
 0x2c4   : > { %v3595_v38 = vpop.f32.mrb[20].mxu0 }
 0x2c5   : > { %1148 = vadd.xlane.f32.xlu1 %v1105_v36  ;;  %v3597_v39 = vpop.f32.mrb[21].mxu0  ;;  %v1116_v61 = vmul.f32 %v3595_v38, %v3595_v38 }
 0x2c6   : > { %4722 = vst [vmem:[#allocation25_spill] sm:$0xff] %v3597_v39  ;;  %1146 = vadd.xlane.f32.xlu0 %v1104_v37  ;;  %v3599_v40 = vpop.f32.mrb[22].mxu0  ;;  %v1114_v63 = vmul.f32 %v3597_v39, %v3597_v39 }
 0x2c7   : > { %v3603_v42 = vpop.f32.mrb[23].mxu0  ;;  %v1117_v60 = vmul.f32 %v3599_v40, %v3599_v40 }
 0x2c8   : > { %v1115_v62 = vmul.f32 %v3603_v42, %v3603_v42 }
 0x2c9   : > { %1144 = vadd.xlane.f32.xlu1 %v1103_v41 }
 0x2ca   : > { %1142 = vadd.xlane.f32.xlu0 %v1102_v43 }
 0x2cc   : > { %v3607_v44 = vpop.f32.mrb[24].mxu0 }
 0x2cd   : > { %4723 = vst [vmem:[#allocation26_spill] sm:$0xff] %v3607_v44  ;;  %1044 = vadd.xlane.f32.xlu1 %v3571_v28  ;;  %v3610_v45 = vpop.f32.mrb[25].mxu0  ;;  %v1120_v1 = vmul.f32 %v3607_v44, %v3607_v44 }
 0x2ce   : > { %4724 = vst [vmem:[#allocation27_spill] sm:$0xff] %v3610_v45  ;;  %1042 = vadd.xlane.f32.xlu0 %v3567_v26  ;;  %v3613_v46 = vpop.f32.mrb[26].mxu0  ;;  %v1118_v3 = vmul.f32 %v3610_v45, %v3610_v45 }
 0x2cf   : > { %4725 = vst [vmem:[#allocation28_spill] sm:$0xff] %v3613_v46  ;;  %v3615_v47 = vpop.f32.mrb[27].mxu0  ;;  %v1121_v0 = vmul.f32 %v3613_v46, %v3613_v46 }
 0x2d0   : > { %4726 = vst [vmem:[#allocation29_spill] sm:$0xff] %v3615_v47  ;;  %v1119_v2 = vmul.f32 %v3615_v47, %v3615_v47 }
 0x2d1   : > { %1040 = vadd.xlane.f32.xlu1 %v3575_v30 }
 0x2d2   : > { %1038 = vadd.xlane.f32.xlu0 %v3569_v27 }
 0x2d4   : > { %v3623_v50 = vpop.f32.mrb[28].mxu0 }
 0x2d5   : > { %4727 = vst [vmem:[#allocation30_spill] sm:$0xff] %v3623_v50  ;;  %1156 = vadd.xlane.f32.xlu1 %v1109_v48  ;;  %v3625_v51 = vpop.f32.mrb[29].mxu0  ;;  %v1124_v12 = vmul.f32 %v3623_v50, %v3623_v50 }
 0x2d6   : > { %4728 = vst [vmem:[#allocation31_spill] sm:$0xff] %v3625_v51  ;;  %1154 = vadd.xlane.f32.xlu0 %v1108_v49  ;;  %v3627_v52 = vpop.f32.mrb[30].mxu0  ;;  %v1122_v6 = vmul.f32 %v3625_v51, %v3625_v51 }
 0x2d7   : > { %4729 = vst [vmem:[#allocation32_spill] sm:$0xff] %v3627_v52  ;;  %v3631_v54 = vpop.f32.mrb[31].mxu0  ;;  %v1125_v5 = vmul.f32 %v3627_v52, %v3627_v52 }
 0x2d8   : > { %4730 = vst [vmem:[#allocation33_spill] sm:$0xff] %v3631_v54  ;;  %v1123_v7 = vmul.f32 %v3631_v54, %v3631_v54 }
 0x2d9   : > { %1152 = vadd.xlane.f32.xlu1 %v1107_v53 }
 0x2da   : > { %1150 = vadd.xlane.f32.xlu0 %v1106_v55 }
 0x2dd   : > { %1052 = vadd.xlane.f32.xlu1 %v3585_v34 }
 0x2de   : > { %1050 = vadd.xlane.f32.xlu0 %v3579_v32 }
 0x2e1   : > { %1048 = vadd.xlane.f32.xlu1 %v3587_v35 }
 0x2e2   : > { %1046 = vadd.xlane.f32.xlu0 %v3582_v33 }
 0x2e5   : > { %1164 = vadd.xlane.f32.xlu1 %v1113_v56 }
 0x2e6   : > { %1162 = vadd.xlane.f32.xlu0 %v1112_v57 }
 0x2e9   : > { %1160 = vadd.xlane.f32.xlu1 %v1111_v58 }
 0x2ea   : > { %1158 = vadd.xlane.f32.xlu0 %v1110_v59 }
 0x2ed   : > { %1060 = vadd.xlane.f32.xlu1 %v3599_v40 }
 0x2ee   : > { %1058 = vadd.xlane.f32.xlu0 %v3595_v38 }
 0x2f1   : > { %1056 = vadd.xlane.f32.xlu1 %v3603_v42 }
 0x2f2   : > { %1054 = vadd.xlane.f32.xlu0 %v3597_v39 }
 0x2f5   : > { %1172 = vadd.xlane.f32.xlu1 %v1117_v60 }
 0x2f6   : > { %1170 = vadd.xlane.f32.xlu0 %v1116_v61 }
 0x2f9   : > { %1168 = vadd.xlane.f32.xlu1 %v1115_v62 }
 0x2fa   : > { %1166 = vadd.xlane.f32.xlu0 %v1114_v63 }
 0x2fd   : > { %1068 = vadd.xlane.f32.xlu1 %v3613_v46 }
 0x2fe   : > { %1066 = vadd.xlane.f32.xlu0 %v3607_v44 }
 0x301   : > { %1064 = vadd.xlane.f32.xlu1 %v3615_v47 }
 0x302   : > { %1062 = vadd.xlane.f32.xlu0 %v3610_v45 }
 0x305   : > { %1180 = vadd.xlane.f32.xlu1 %v1121_v0 }
 0x306   : > { %1178 = vadd.xlane.f32.xlu0 %v1120_v1 }
 0x309   : > { %1176 = vadd.xlane.f32.xlu1 %v1119_v2 }
 0x30a   : > { %1174 = vadd.xlane.f32.xlu0 %v1118_v3 }
 0x30d   : > { %1076 = vadd.xlane.f32.xlu1 %v3627_v52 }
 0x30e   : > { %1074 = vadd.xlane.f32.xlu0 %v3623_v50 }
 0x311   : > { %1072 = vadd.xlane.f32.xlu1 %v3631_v54 }
 0x312   : > { %1070 = vadd.xlane.f32.xlu0 %v3625_v51 }
 0x315   : > { %1188 = vadd.xlane.f32.xlu1 %v1125_v5 }
 0x316   : > { %1182 = vadd.xlane.f32.xlu0 %v1122_v6 }
 0x319   : > { %1184 = vadd.xlane.f32.xlu1 %v1123_v7 }
 0x31a   : > { %1186 = vadd.xlane.f32.xlu0 %v1124_v12 }
 0x32a   : > { %v1019_v13 = vpop.xlane.xlu1 %1018 }
 0x32b   : > { %v1015_v17 = vpop.xlane.xlu0 %1014 }
 0x32e   : > { %v1021_v19 = vpop.xlane.xlu1 %1020 }
 0x32f   : > { %v1131_v24 = vpop.xlane.xlu0 %1130 }
 0x332   : > { %v1133_v25 = vpop.xlane.xlu1 %1132 }
 0x333   : > { %v1017_v29 = vpop.xlane.xlu0 %1016 }
 0x336   : > { %v1129_v31 = vpop.xlane.xlu1 %1128 }
 0x337   : > { %v1127_v36 = vpop.xlane.xlu0 %1126 }
 0x33a   : > { %v3683_v37 = vpop.xlane.xlu1 %1028 }
 0x33b   : > { %v3685_v41 = vpop.xlane.xlu0 %1026 }
 0x33e   : > { %v3687_v43 = vpop.xlane.xlu1 %1024 }
 0x33f   : > { %v3689_v48 = vpop.xlane.xlu0 %1022 }
 0x342   : > { %v3691_v49 = vpop.xlane.xlu1 %1140 }
 0x343   : > { %v3693_v53 = vpop.xlane.xlu0 %1138 }
 0x346   : > { %v3695_v55 = vpop.xlane.xlu1 %1136 }
 0x347   : > { %v3697_v56 = vpop.xlane.xlu0 %1134 }
 0x34a   : > { %v3699_v57 = vpop.xlane.xlu1 %1036 }
 0x34b   : > { %v3701_v58 = vpop.xlane.xlu0 %1034 }
 0x34e   : > { %v3703_v59 = vpop.xlane.xlu1 %1032 }
 0x34f   : > { %v3705_v60 = vpop.xlane.xlu0 %1030 }
 0x352   : > { %v3707_v61 = vpop.xlane.xlu1 %1148 }
 0x353   : > { %v3709_v62 = vpop.xlane.xlu0 %1146 }
 0x356   : > { %v3711_v63 = vpop.xlane.xlu1 %1144 }
 0x357   : > { %v3713_v0 = vpop.xlane.xlu0 %1142 }
 0x35a   : > { %v3715_v1 = vpop.xlane.xlu1 %1044 }
 0x35b   : > { %v3717_v2 = vpop.xlane.xlu0 %1042 }
 0x35e   : > { %v3719_v3 = vpop.xlane.xlu1 %1040 }
 0x35f   : > { %v3721_v4 = vpop.xlane.xlu0 %1038 }
 0x362   : > { %v3723_v5 = vpop.xlane.xlu1 %1156 }
 0x363   : > { %v3725_v6 = vpop.xlane.xlu0 %1154 }
 0x366   : > { %v3727_v7 = vpop.xlane.xlu1 %1152 }
 0x367   : > { %v3729_v12 = vpop.xlane.xlu0 %1150 }
 0x36a   : > { %v1053_v50 = vpop.xlane.xlu1 %1052 }
 0x36b   : > { %v1051_v26 = vpop.xlane.xlu0 %1050  ;;  %v1081_v51 = vadd.f32 %v1053_v50, %v1021_v19 }
 0x36c   : > { %v1080_v27 = vadd.f32 %v1051_v26, %v1019_v13 }
 0x36d   : > { %v3731_v45 = vmul.f32 0.015625, %v1081_v51 }
 0x36e   : > { %v1049_v52 = vpop.xlane.xlu1 %1048  ;;  %v3733_v21 = vmul.f32 0.015625, %v1080_v27 }
 0x36f   : > { %v1047_v28 = vpop.xlane.xlu0 %1046  ;;  %v1079_v54 = vadd.f32 %v1049_v52, %v1017_v29  ;;  %v1241_v39 = vmul.f32 %v3731_v45, %v3731_v45 }
 0x370   : > { %v1078_v30 = vadd.f32 %v1047_v28, %v1015_v17  ;;  %v1240_v26 = vmul.f32 %v3733_v21, %v3733_v21 }
 0x371   : > { %v3737_v15 = vmul.f32 0.015625, %v1079_v54 }
 0x372   : > { %v1165_v44 = vpop.xlane.xlu1 %1164  ;;  %v3741_v50 = vmul.f32 0.015625, %v1078_v30 }
 0x373   : > { %v1193_v20 = vadd.f32 %v1165_v44, %v1133_v25  ;;  %v1163_v47 = vpop.xlane.xlu0 %1162 }
 0x374   : > { %v1192_v23 = vadd.f32 %v1163_v47, %v1131_v24  ;;  %v1239_v47 = vmul.f32 %v3737_v15, %v3737_v15 }
 0x375   : > { %v1225_v46 = vmul.f32 0.015625, %v1193_v20  ;;  %v1238_v20 = vmul.f32 %v3741_v50, %v3741_v50 }
 0x376   : > { %v1224_v51 = vmul.f32 0.015625, %v1192_v23  ;;  %v1161_v52 = vpop.xlane.xlu1 %1160 }
 0x377   : > { %v1257_v27 = vsub.f32 %v1225_v46, %v1241_v39  ;;  %v1191_v13 = vadd.f32 %v1161_v52, %v1129_v31  ;;  %v1159_v28 = vpop.xlane.xlu0 %1158 }
 0x378   : > { %v1256_v17 = vsub.f32 %v1224_v51, %v1240_v26  ;;  %v1190_v44 = vadd.f32 %v1159_v28, %v1127_v36 }
 0x379   : > { %v1273_v19 = vadd.f32 1e-05, %v1257_v27  ;;  %v1223_v24 = vmul.f32 0.015625, %v1191_v13 }
 0x37a   : > { %v1272_v54 = vadd.f32 1e-05, %v1256_v17  ;;  %v1222_v25 = vmul.f32 0.015625, %v1190_v44  ;;  %v1061_v29 = vpop.xlane.xlu1 %1060 }
 0x37b   : > { %2793 = vrsqrt.f32 %v1273_v19  ;;  %v1255_v30 = vsub.f32 %v1223_v24, %v1239_v47  ;;  %v1059_v23 = vpop.xlane.xlu0 %1058  ;;  %v1085_v31 = vadd.f32 %v1061_v29, %v3683_v37  ;;  %v1305_v24 = vld [vmem:[%s3487_s9 + $0x10] sm:$0xff] }
 0x37c   : > { %2795 = vrsqrt.f32 %v1272_v54  ;;  %v1254_v39 = vsub.f32 %v1222_v25, %v1238_v20  ;;  %v1084_v26 = vadd.f32 %v1059_v23, %v3685_v41  ;;  %v1306_v41 = vld [vmem:[%s3487_s9 + $0x18] sm:$0xff] }
 0x37d   : > { %v1271_v46 = vadd.f32 1e-05, %v1255_v30  ;;  %v3749_v27 = vmul.f32 0.015625, %v1085_v31 }
 0x37e   : > { %v1270_v36 = vadd.f32 1e-05, %v1254_v39  ;;  %v1057_v51 = vpop.xlane.xlu1 %1056  ;;  %v3752_v28 = vmul.f32 0.015625, %v1084_v26  ;;  %v1304_v26 = vld [vmem:[%s3487_s9 + $0x8] sm:$0xff] }
 0x37f   : > { %2797 = vrsqrt.f32 %v1271_v46  ;;  %v1055_v52 = vpop.xlane.xlu0 %1054  ;;  %v1083_v13 = vadd.f32 %v1057_v51, %v3687_v43  ;;  %v1245_v54 = vmul.f32 %v3749_v27, %v3749_v27 }
 0x380   : > { %2799 = vrsqrt.f32 %v1270_v36  ;;  %v1082_v17 = vadd.f32 %v1055_v52, %v3689_v48  ;;  %v1244_v48 = vmul.f32 %v3752_v28, %v3752_v28 }
 0x381   : > { %v3761_v25 = vmul.f32 0.015625, %v1083_v13  ;;  %v1303_v13 = vld [vmem:[%s3487_s9] sm:$0xff] }
 0x382   : > { %v1173_v44 = vpop.xlane.xlu1 %1172  ;;  %v3765_v30 = vmul.f32 0.015625, %v1082_v17 }
 0x383   : > { %v1197_v47 = vadd.f32 %v1173_v44, %v3691_v49  ;;  %v1171_v37 = vpop.xlane.xlu0 %1170 }
 0x384   : > { %v1196_v19 = vadd.f32 %v1171_v37, %v3693_v53 }
 0x385   : > { %v2794_v20 = vpop.eup %2793  ;;  %v1229_v43 = vmul.f32 0.015625, %v1197_v47  ;;  %v1243_v47 = vmul.f32 %v3761_v25, %v3761_v25 }
 0x386   : > { %v2796_v29 = vpop.eup %2795  ;;  %v1228_v49 = vmul.f32 0.015625, %v1196_v19  ;;  %v1169_v23 = vpop.xlane.xlu1 %1168  ;;  %v1339_v36 = vmul.f32 %v2794_v20, %v1306_v41 }
 0x387   : > { %v1261_v53 = vsub.f32 %v1229_v43, %v1245_v54  ;;  %v1195_v39 = vadd.f32 %v1169_v23, %v3695_v55  ;;  %v1167_v46 = vpop.xlane.xlu0 %1166  ;;  %v1338_v31 = vmul.f32 %v2796_v29, %v1305_v24  ;;  %v1242_v55 = vmul.f32 %v3765_v30, %v3765_v30  ;;  %v1323_v23 = vld [vmem:[%s3489_s2 + $0x18] sm:$0xff] }
 0x388   : > { %v1260_v51 = vsub.f32 %v1228_v49, %v1244_v48  ;;  %v1194_v52 = vadd.f32 %v1167_v46, %v3697_v56  ;;  %v1355_v48 = vmul.f32 %v1339_v36, %v3731_v45 }
 0x389   : > { %v2798_v44 = vpop.eup %2797  ;;  %v1277_v37 = vadd.f32 1e-05, %v1261_v53  ;;  %v1227_v17 = vmul.f32 0.015625, %v1195_v39  ;;  %1396 = vperm.xlu1 %2767, %v1338_v31   ;;  %v1354_v45 = vmul.f32 %v1338_v31, %v3733_v21 }
 0x38a   : > { %v2800_v19 = vpop.eup %2799  ;;  %v1276_v54 = vadd.f32 1e-05, %v1260_v51  ;;  %v1226_v24 = vmul.f32 0.015625, %v1194_v52  ;;  %v1069_v41 = vpop.xlane.xlu1 %1068  ;;  %v1337_v20 = vmul.f32 %v2798_v44, %v1304_v26  ;;  %v1371_v44 = vsub.f32 %v1323_v23, %v1355_v48 }
 0x38b   : > { %2801 = vrsqrt.f32 %v1277_v37  ;;  %v1259_v43 = vsub.f32 %v1227_v17, %v1243_v47  ;;  %v1067_v56 = vpop.xlane.xlu0 %1066  ;;  %v1336_v29 = vmul.f32 %v2800_v19, %v1303_v13  ;;  %v1089_v46 = vadd.f32 %v1069_v41, %v3699_v57  ;;  %v1321_v37 = vld [vmem:[%s3489_s2 + $0x8] sm:$0xff] }
 0x38c   : > { %2803 = vrsqrt.f32 %v1276_v54  ;;  %v1258_v49 = vsub.f32 %v1226_v24, %v1242_v55  ;;  %v1353_v53 = vmul.f32 %v1337_v20, %v3737_v15  ;;  %v1088_v26 = vadd.f32 %v1067_v56, %v3701_v58  ;;  %v1322_v15 = vld [vmem:[%s3489_s2 + $0x10] sm:$0xff]  ;;  %v1310_v54 = vld [vmem:[%s3487_s9 + $0x38] sm:$0xff] }
 0x38d   : > { %v1275_v39 = vadd.f32 1e-05, %v1259_v43  ;;  %1386 = vperm.xlu0 %2768, %v1336_v29   ;;  %1401 = vperm.xlu1 %2767, %v1339_v36   ;;  %v3784_v57 = vmul.f32 0.015625, %v1089_v46  ;;  %v1370_v55 = vsub.f32 %v1322_v15, %v1354_v45  ;;  %v1320_v43 = vld [vmem:[%s3489_s2] sm:$0xff]  ;;  %v1309_v56 = vld [vmem:[%s3487_s9 + $0x30] sm:$0xff] }
 0x38e   : > { %v1274_v51 = vadd.f32 1e-05, %v1258_v49  ;;  %v1065_v52 = vpop.xlane.xlu1 %1064  ;;  %v3787_v58 = vmul.f32 0.015625, %v1088_v26  ;;  %v1369_v31 = vsub.f32 %v1321_v37, %v1353_v53  ;;  %v1327_v26 = vld [vmem:[%s3489_s2 + $0x38] sm:$0xff]  ;;  %v1307_v15 = vld [vmem:[%s3487_s9 + $0x20] sm:$0xff] }
 0x38f   : > { %2805 = vrsqrt.f32 %v1275_v39  ;;  %v1063_v13 = vpop.xlane.xlu0 %1062  ;;  %v1087_v47 = vadd.f32 %v1065_v52, %v3703_v59  ;;  %v1352_v59 = vmul.f32 %v1336_v29, %v3741_v50 }
 0x390   : > { %2807 = vrsqrt.f32 %v1274_v51  ;;  %v1086_v36 = vadd.f32 %v1063_v13, %v3705_v60  ;;  %v1248_v50 = vmul.f32 %v3787_v58, %v3787_v58  ;;  %v1308_v13 = vld [vmem:[%s3487_s9 + $0x28] sm:$0xff] }
 0x391   : > { %1513 = vperm.xlu0 %2768, %v1371_v44   ;;  %1391 = vperm.xlu1 %2767, %v1337_v20   ;;  %v3792_v24 = vmul.f32 0.015625, %v1087_v47  ;;  %v1249_v20 = vmul.f32 %v3784_v57, %v3784_v57  ;;  %v1368_v51 = vsub.f32 %v1320_v43, %v1352_v59 }
 0x392   : > { %v1181_v17 = vpop.xlane.xlu1 %1180  ;;  %v3799_v48 = vmul.f32 0.015625, %v1086_v36 }
 0x393   : > { %v1201_v19 = vadd.f32 %v1181_v17, %v3707_v61  ;;  %v1179_v21 = vpop.xlane.xlu0 %1178  ;;  %v1247_v44 = vmul.f32 %v3792_v24, %v3792_v24 }
 0x394   : > { %v1200_v41 = vadd.f32 %v1179_v21, %v3709_v62  ;;  %v1246_v17 = vmul.f32 %v3799_v48, %v3799_v48 }
 0x395   : > { %v2802_v60 = vpop.eup %2801  ;;  %v1233_v61 = vmul.f32 0.015625, %v1201_v19  ;;  %1503 = vperm.xlu0 %2768, %v1369_v31   ;;  %1508 = vperm.xlu1 %2767, %v1370_v55  }
 0x396   : > { %v2804_v49 = vpop.eup %2803  ;;  %v1232_v29 = vmul.f32 0.015625, %v1200_v41  ;;  %v1177_v62 = vpop.xlane.xlu1 %1176  ;;  %v1343_v23 = vmul.f32 %v2802_v60, %v1310_v54 }
 0x397   : > { %v1265_v53 = vsub.f32 %v1233_v61, %v1249_v20  ;;  %v1199_v39 = vadd.f32 %v1177_v62, %v3711_v63  ;;  %v1175_v46 = vpop.xlane.xlu0 %1174  ;;  %v1342_v52 = vmul.f32 %v2804_v49, %v1309_v56  ;;  %v1325_v56 = vld [vmem:[%s3489_s2 + $0x28] sm:$0xff] }
 0x398   : > { %v1264_v45 = vsub.f32 %v1232_v29, %v1248_v50  ;;  %v1198_v47 = vadd.f32 %v1175_v46, %v3713_v0  ;;  %v1359_v37 = vmul.f32 %v1343_v23, %v3749_v27 }
 0x399   : > { %v2806_v36 = vpop.eup %2805  ;;  %v1281_v63 = vadd.f32 1e-05, %v1265_v53  ;;  %v1231_v19 = vmul.f32 0.015625, %v1199_v39  ;;  %1498 = vperm.xlu1 %2767, %v1368_v51   ;;  %v3814_v21 = vmul.f32 %v1342_v52, %v3752_v28 }
 0x39a   : > { %v2808_v31 = vpop.eup %2807  ;;  %v1280_v55 = vadd.f32 1e-05, %v1264_v45  ;;  %v1230_v59 = vmul.f32 0.015625, %v1198_v47  ;;  %v1077_v54 = vpop.xlane.xlu1 %1076  ;;  %v1375_v41 = vsub.f32 %v1327_v26, %v1359_v37  ;;  %v1341_v0 = vmul.f32 %v2806_v36, %v1308_v13  ;;  %v1314_v13 = vld [vmem:[%s3487_s9 + $0x58] sm:$0xff]  ;;  %v1313_v47 = vld [vmem:[%s3487_s9 + $0x50] sm:$0xff] }
 0x39b   : > { %2809 = vrsqrt.f32 %v1281_v63  ;;  %v1263_v27 = vsub.f32 %v1231_v19, %v1247_v44  ;;  %v1075_v43 = vpop.xlane.xlu0 %1074  ;;  %v1340_v60 = vmul.f32 %v2808_v31, %v1307_v15  ;;  %v1093_v28 = vadd.f32 %v1077_v54, %v3715_v1 }
 0x39c   : > { %2811 = vrsqrt.f32 %v1280_v55  ;;  %v1262_v20 = vsub.f32 %v1230_v59, %v1246_v17  ;;  %1533 = vperm.xlu0 %2768, %v1375_v41   ;;  %v1357_v61 = vmul.f32 %v1341_v0, %v3761_v25  ;;  %v1092_v44 = vadd.f32 %v1075_v43, %v3717_v2  ;;  %v1312_v55 = vld [vmem:[%s3487_s9 + $0x48] sm:$0xff] }
 0x39d   : > { %v1279_v49 = vadd.f32 1e-05, %v1263_v27  ;;  %1416 = vperm.xlu1 %2767, %v1342_v52   ;;  %v3820_v50 = vmul.f32 %v1340_v60, %v3765_v30  ;;  %v3823_v51 = vmul.f32 0.015625, %v1093_v28 }
 0x39e   : > { %v1278_v29 = vadd.f32 1e-05, %v1262_v20  ;;  %v1073_v62 = vpop.xlane.xlu1 %1072  ;;  %v1373_v53 = vsub.f32 %v1325_v56, %v1357_v61  ;;  %v3841_v54 = vmul.f32 0.015625, %v1092_v44  ;;  %v1311_v56 = vld [vmem:[%s3487_s9 + $0x40] sm:$0xff]  ;;  %v1329_v44 = vld [vmem:[%s3489_s2 + $0x48] sm:$0xff] }
 0x39f   : > { %2813 = vrsqrt.f32 %v1279_v49  ;;  %v1071_v39 = vpop.xlane.xlu0 %1070  ;;  %v1091_v25 = vadd.f32 %v1073_v62, %v3719_v3  ;;  %v1253_v37 = vmul.f32 %v3823_v51, %v3823_v51 }
 0x3a0   : > { %2815 = vrsqrt.f32 %v1278_v29  ;;  %v1090_v46 = vadd.f32 %v1071_v39, %v3721_v4  ;;  %1523 = vperm.xlu0 %2768, %v1373_v53   ;;  %v1331_v39 = vld [vmem:[%s3489_s2 + $0x58] sm:$0xff] }
 0x3a1   : > { %1406 = vperm.xlu1 %2767, %v1340_v60   ;;  %v3835_v15 = vmul.f32 0.015625, %v1091_v25  ;;  %v1252_v25 = vmul.f32 %v3841_v54, %v3841_v54 }
 0x3a2   : > { %v3826_v1 = vmul.f32 0.015625, %v1090_v46  ;;  %v1189_v30 = vpop.xlane.xlu1 %1188 }
 0x3a3   : > { %v1205_v26 = vadd.f32 %v1189_v30, %v3723_v5  ;;  %v1183_v52 = vpop.xlane.xlu0 %1182  ;;  %v1251_v20 = vmul.f32 %v3835_v15, %v3835_v15 }
 0x3a4   : > { %v1202_v45 = vadd.f32 %v1183_v52, %v3729_v12  ;;  %v1250_v5 = vmul.f32 %v3826_v1, %v3826_v1 }
 0x3a5   : > { %v2810_v4 = vpop.eup %2809  ;;  %v1237_v3 = vmul.f32 0.015625, %v1205_v26  ;;  %1421 = vperm.xlu1 %2767, %v1343_v23   ;;  %v1326_v23 = vld [vmem:[%s3489_s2 + $0x30] sm:$0xff] }
 0x3a6   : > { %v2812_v36 = vpop.eup %2811  ;;  %v1234_v17 = vmul.f32 0.015625, %v1202_v45  ;;  %v1185_v2 = vpop.xlane.xlu1 %1184  ;;  %v1347_v63 = vmul.f32 %v2810_v4, %v1314_v13  ;;  %v1318_v4 = vld [vmem:[%s3487_s9 + $0x78] sm:$0xff] }
 0x3a7   : > { %v1269_v19 = vsub.f32 %v1237_v3, %v1253_v37  ;;  %v1203_v12 = vadd.f32 %v1185_v2, %v3727_v7  ;;  %v1187_v31 = vpop.xlane.xlu0 %1186  ;;  %v1346_v59 = vmul.f32 %v2812_v36, %v1313_v47  ;;  %v1315_v37 = vld [vmem:[%s3487_s9 + $0x60] sm:$0xff]  ;;  %v1316_v36 = vld [vmem:[%s3487_s9 + $0x68] sm:$0xff] }
 0x3a8   : > { %v1266_v41 = vsub.f32 %v1234_v17, %v1250_v5  ;;  %v1204_v27 = vadd.f32 %v1187_v31, %v3725_v6  ;;  %1441 = vperm.xlu0 %2768, %v1347_v63   ;;  %v1363_v43 = vmul.f32 %v1347_v63, %v3784_v57  ;;  %v1374_v57 = vsub.f32 %v1326_v23, %v3814_v21  ;;  %v1333_v31 = vld [vmem:[%s3489_s2 + $0x68] sm:$0xff]  ;;  %v1335_v23 = vld [vmem:[%s3489_s2 + $0x78] sm:$0xff] }
 0x3a9   : > { %v2814_v60 = vpop.eup %2813  ;;  %v1285_v61 = vadd.f32 1e-05, %v1269_v19  ;;  %v1235_v7 = vmul.f32 0.015625, %v1203_v12  ;;  %1411 = vperm.xlu1 %2767, %v1341_v0   ;;  %v1362_v49 = vmul.f32 %v1346_v59, %v3787_v58  ;;  %v1324_v0 = vld [vmem:[%s3489_s2 + $0x20] sm:$0xff] }
 0x3aa   : > { %v2816_v28 = vpop.eup %2815  ;;  %v1282_v29 = vadd.f32 1e-05, %v1266_v41  ;;  %v1236_v62 = vmul.f32 0.015625, %v1204_v27  ;;  %v1345_v6 = vmul.f32 %v2814_v60, %v1312_v55  ;;  %v1379_v13 = vsub.f32 %v1331_v39, %v1363_v43  ;;  %v1612_v39 = vld [vmem:[#allocation3 + $0x18] sm:$0xff] }
 0x3ab   : > { %2817 = vrsqrt.f32 %v1285_v61  ;;  %v1267_v53 = vsub.f32 %v1235_v7, %v1251_v20  ;;  %v1344_v46 = vmul.f32 %v2816_v28, %v1311_v56  ;;  %v1372_v21 = vsub.f32 %v1324_v0, %v3820_v50  ;;  %v1330_v50 = vld [vmem:[%s3489_s2 + $0x50] sm:$0xff] }
 0x3ac   : > { %2819 = vrsqrt.f32 %v1282_v29  ;;  %1431 = vperm.xlu0 %2768, %v1345_v6   ;;  %v1361_v58 = vmul.f32 %v1345_v6, %v3792_v24  ;;  %v1268_v52 = vsub.f32 %v1236_v62, %v1252_v25  ;;  %v1378_v12 = vsub.f32 %v1330_v50, %v1362_v49 }
 0x3ad   : > { %v1283_v30 = vadd.f32 1e-05, %v1267_v53  ;;  %1528 = vperm.xlu1 %2767, %v1374_v57   ;;  %v1360_v26 = vmul.f32 %v1344_v46, %v3799_v48 }
 0x3ae   : > { %v1284_v45 = vadd.f32 1e-05, %v1268_v52  ;;  %v1377_v47 = vsub.f32 %v1329_v44, %v1361_v58  ;;  %v1610_v52 = vld [vmem:[#allocation3 + $0x8] sm:$0xff] }
 0x3af   : > { %2821 = vrsqrt.f32 %v1283_v30  ;;  %v1626_v44 = vld [vmem:[#allocation3 + $0x88] sm:$0xff] }
 0x3b0   : > { %1553 = vperm.xlu0 %2768, %v1379_v13   ;;  %2823 = vrsqrt.f32 %v1284_v45  ;;  %v1611_v45 = vld [vmem:[#allocation3 + $0x10] sm:$0xff] }
 0x3b1   : > { %1518 = vperm.xlu1 %2767, %v1372_v21  }
 0x3b4   : > { %1543 = vperm.xlu0 %2768, %v1377_v47   ;;  %v1627_v47 = vld [vmem:[#allocation3 + $0x90] sm:$0xff] }
 0x3b5   : > { %v2818_v24 = vpop.eup %2817  ;;  %1436 = vperm.xlu1 %2767, %v1346_v59   ;;  %v1328_v59 = vld [vmem:[%s3489_s2 + $0x40] sm:$0xff] }
 0x3b6   : > { %v2820_v3 = vpop.eup %2819  ;;  %v1351_v48 = vmul.f32 %v2818_v24, %v1318_v4  ;;  %v1376_v27 = vsub.f32 %v1328_v59, %v1360_v26 }
 0x3b7   : > { %v1348_v5 = vmul.f32 %v2820_v3, %v1315_v37 }
 0x3b8   : > { %1461 = vperm.xlu0 %2768, %v1351_v48   ;;  %v1367_v17 = vmul.f32 %v1351_v48, %v3823_v51  ;;  %v1317_v51 = vld [vmem:[%s3487_s9 + $0x70] sm:$0xff] }
 0x3b9   : > { %v2822_v2 = vpop.eup %2821  ;;  %1426 = vperm.xlu1 %2767, %v1344_v46   ;;  %v1364_v63 = vmul.f32 %v1348_v5, %v3826_v1  ;;  %v1332_v1 = vld [vmem:[%s3489_s2 + $0x60] sm:$0xff]  ;;  %v1628_v46 = vld [vmem:[#allocation3 + $0x98] sm:$0xff] }
 0x3ba   : > { %v1349_v19 = vmul.f32 %v2822_v2, %v1316_v36  ;;  %v2824_v43 = vpop.eup %2823  ;;  %v1383_v56 = vsub.f32 %v1335_v23, %v1367_v17 }
 0x3bb   : > { %v1350_v60 = vmul.f32 %v2824_v43, %v1317_v51  ;;  %v1380_v61 = vsub.f32 %v1332_v1, %v1364_v63 }
 0x3bc   : > { %1451 = vperm.xlu0 %2768, %v1349_v19   ;;  %v1365_v55 = vmul.f32 %v1349_v19, %v3835_v15  ;;  %v1334_v15 = vld [vmem:[%s3489_s2 + $0x70] sm:$0xff]  ;;  %v1609_v19 = vld [vmem:[#allocation3] sm:$0xff] }
 0x3bd   : > { %1548 = vperm.xlu1 %2767, %v1378_v12   ;;  %v1366_v20 = vmul.f32 %v1350_v60, %v3841_v54  ;;  %v1625_v12 = vld [vmem:[#allocation3 + $0x80] sm:$0xff] }
 0x3be   : > { %v1381_v41 = vsub.f32 %v1333_v31, %v1365_v55 }
 0x3bf   : > { %v1382_v7 = vsub.f32 %v1334_v15, %v1366_v20 }
 0x3c0   : > { %1563 = vperm.xlu0 %2768, %v1381_v41  }
 0x3c1   : > { %1538 = vperm.xlu1 %2767, %v1376_v27  }
 0x3c4   : > { %1573 = vperm.xlu0 %2768, %v1383_v56  }
 0x3c5   : > { %1456 = vperm.xlu1 %2767, %v1350_v60  }
 0x3c9   : > { %1446 = vperm.xlu1 %2767, %v1348_v5  }
 0x3cd   : > { %1558 = vperm.xlu1 %2767, %v1380_v61  }
 0x3d1   : > { %1568 = vperm.xlu1 %2767, %v1382_v7  }
 0x408   : > { %v1397_v49 = vpop.permute.xlu1 %1396 }
 0x409   : > { %v1466_v28 = vmul.f32 %v3523_v8, %v1397_v49  ;;  %v1482_v29 = vmul.f32 %v3579_v32, %v1397_v49  ;;  %v2121_v49 = vlaneseq }
 0x40c   : > { %v1387_v62 = vpop.permute.xlu0 %1386  ;;  %v1402_v6 = vpop.permute.xlu1 %1401 }
 0x40d   : > { %v1467_v53 = vmul.f32 %v3529_v10, %v1402_v6  ;;  %v1483_v57 = vmul.f32 %v3585_v34, %v1402_v6  ;;  %v1464_v48 = vmul.f32 %v1387_v62, %v3526_v9 }
 0x410   : > { %v1514_v25 = vpop.permute.xlu0 %1513  ;;  %v1392_v54 = vpop.permute.xlu1 %1391 }
 0x411   : > { %v1579_v0 = vadd.f32 %v1514_v25, %v1467_v53  ;;  %v1595_v58 = vadd.f32 %v1514_v25, %v1483_v57  ;;  %v1465_v8 = vmul.f32 %v1392_v54, %v3531_v11  ;;  %v1481_v32 = vmul.f32 %v1392_v54, %v3587_v35 }
 0x412   : > { %v1480_v11 = vmul.f32 %v1387_v62, %v3582_v33  ;;  %v3909_v25 = vand.u32 127, %v2121_v49 }
 0x413   : > { %v3877_v30 = vadd.f32 %v1612_v39, %v1579_v0  ;;  %v3879_v26 = vadd.f32 %v1628_v46, %v1595_v58 }
 0x414   : > { %v1504_v13 = vpop.permute.xlu0 %1503  ;;  %v1509_v21 = vpop.permute.xlu1 %1508  ;;  %vm2123_vm0 = vcmp.lt.s32.totalorder %v3909_v25, 32 }
 0x415   : > { %v1708_v10 = vmin.f32 %v3877_v30, 20.0  ;;  %v1724_v34 = vmin.f32 %v3879_v26, 20.0  ;;  %v1577_v4 = vadd.f32 %v1504_v13, %v1465_v8  ;;  %v1593_v37 = vadd.f32 %v1504_v13, %v1481_v32 }
 0x416   : > { %v1578_v24 = vadd.f32 %v1509_v21, %v1466_v28  ;;  %v1594_v3 = vadd.f32 %v1509_v21, %v1482_v29  ;;  %vm1676_vm2 = vcmp.gt.f32.partialorder %v3877_v30, 20.0  ;;  %vm1692_vm4 = vcmp.gt.f32.partialorder %v3879_v26, 20.0 }
 0x417   : > { %v1743_v36 = vmul.f32 1.442695, %v1708_v10  ;;  %v1775_v35 = vmul.f32 1.442695, %v1724_v34  ;;  %v3887_v5 = vadd.f32 %v1610_v52, %v1577_v4  ;;  %v3889_v50 = vadd.f32 %v1626_v44, %v1593_v37 }
 0x418   : > { %v3891_v17 = vadd.f32 %v1611_v45, %v1578_v24  ;;  %v3893_v2 = vadd.f32 %v1627_v47, %v1594_v3  ;;  %v1499_v63 = vpop.permute.xlu1 %1498 }
 0x419   : > { %2825 = vpow2.f32 %v1743_v36  ;;  %v1576_v31 = vadd.f32 %v1499_v63, %v1464_v48  ;;  %v1592_v55 = vadd.f32 %v1499_v63, %v1480_v11  ;;  %v1706_v9 = vmin.f32 %v3887_v5, 20.0  ;;  %v1616_v11 = vld [vmem:[#allocation3 + $0x38] sm:$0xff] }
 0x41a   : > { %2827 = vpow2.f32 %v1775_v35  ;;  %v1722_v33 = vmin.f32 %v3889_v50, 20.0  ;;  %v1707_v59 = vmin.f32 %v3891_v17, 20.0  ;;  %v1723_v27 = vmin.f32 %v3893_v2, 20.0 }
 0x41b   : > { %v1739_v41 = vmul.f32 1.442695, %v1706_v9  ;;  %v3899_v23 = vadd.f32 %v1609_v19, %v1576_v31  ;;  %v3901_v43 = vadd.f32 %v1625_v12, %v1592_v55  ;;  %v1534_v20 = vpop.permute.xlu0 %1533  ;;  %vm1674_vm5 = vcmp.gt.f32.partialorder %v3887_v5, 20.0 }
 0x41c   : > { %v1417_v51 = vpop.permute.xlu1 %1416  ;;  %v1771_v56 = vmul.f32 1.442695, %v1722_v33  ;;  %v1741_v60 = vmul.f32 1.442695, %v1707_v59  ;;  %v1773_v1 = vmul.f32 1.442695, %v1723_v27 }
 0x41d   : > { %2829 = vpow2.f32 %v1739_v41  ;;  %v1705_v61 = vmin.f32 %v3899_v23, 20.0  ;;  %v1721_v15 = vmin.f32 %v3901_v43, 20.0  ;;  %v3914_v10 = vmul.f32 %v3538_v14, %v1417_v51 }
 0x41e   : > { %2831 = vpow2.f32 %v1771_v56  ;;  %v3917_v34 = vmul.f32 %v3595_v38, %v1417_v51  ;;  %vm1690_vm8 = vcmp.gt.f32.partialorder %v3889_v50, 20.0  ;;  %vm1675_vm9 = vcmp.gt.f32.partialorder %v3891_v17, 20.0 }
 0x41f   : > { %2833 = vpow2.f32 %v1741_v60  ;;  %v1737_v28 = vmul.f32 1.442695, %v1705_v61  ;;  %v1769_v29 = vmul.f32 1.442695, %v1721_v15  ;;  %v3907_v39 = vpop.permute.xlu0 %1523  ;;  %vm1691_vm12 = vcmp.gt.f32.partialorder %v3893_v2, 20.0 }
 0x420   : > { %v3905_v7 = vpop.permute.xlu1 %1406  ;;  %2835 = vpow2.f32 %v1773_v1  ;;  %vm1673_vm14 = vcmp.gt.f32.partialorder %v3899_v23, 20.0  ;;  %vm1689_vm15 = vcmp.gt.f32.partialorder %v3901_v43, 20.0 }
 0x421   : > { %2837 = vpow2.f32 %v1737_v28 }
 0x422   : > { %2839 = vpow2.f32 %v1769_v29 }
 0x423   : > { %v2826_v62 = vpop.eup %2825 }
 0x424   : > { %v2828_v6 = vpop.eup %2827  ;;  %v1828_v53 = vadd.f32 1.0, %v2826_v62  ;;  %v1831_v57 = vmul.f32 -0.5, %v2826_v62  ;;  %v1422_v46 = vpop.permute.xlu1 %1421  ;;  %v1834_v32 = vand.u32 2147483647, %v2826_v62 }
 0x425   : > { %v1972_v54 = vadd.f32 1.0, %v2828_v6  ;;  %v1975_v0 = vmul.f32 -0.5, %v2828_v6  ;;  %v1471_v58 = vmul.f32 %v3543_v16, %v1422_v46  ;;  %v1487_v52 = vmul.f32 %v3599_v40, %v1422_v46 }
 0x426   : > { %2841 = vlog2.f32 %v1828_v53  ;;  %v1832_v8 = vadd.f32 1.0, %v1831_v57  ;;  %v1978_v13 = vand.u32 2147483647, %v2828_v6  ;;  %vm3922_vm1 = vcmp.lt.f32.partialorder %v1834_v32, 0.0004427343 }
 0x427   : > { %2843 = vlog2.f32 %v1972_v54  ;;  %v2830_v21 = vpop.eup %2829  ;;  %v3919_v44 = vpop.permute.xlu0 %1441  ;;  %v1976_v47 = vadd.f32 1.0, %v1975_v0  ;;  %v1583_v37 = vadd.f32 %v1534_v20, %v1471_v58  ;;  %v1599_v38 = vadd.f32 %v1534_v20, %v1487_v52  ;;  %v1632_v0 = vld [vmem:[#allocation3 + $0xb8] sm:$0xff] }
 0x428   : > { %v2832_v45 = vpop.eup %2831  ;;  %v1810_v4 = vadd.f32 1.0, %v2830_v21  ;;  %v1813_v16 = vmul.f32 -0.5, %v2830_v21  ;;  %v1833_v40 = vmul.f32 %v2826_v62, %v1832_v8  ;;  %vm3927_vm3 = vcmp.lt.f32.partialorder %v1978_v13, 0.0004427343 }
 0x429   : > { %v2834_v24 = vpop.eup %2833  ;;  %v1954_v14 = vadd.f32 1.0, %v2832_v45  ;;  %v1957_v48 = vmul.f32 -0.5, %v2832_v45  ;;  %v1816_v63 = vand.u32 2147483647, %v2830_v21  ;;  %v3933_v12 = vmul.f32 %v3557_v22, %v3919_v44 }
 0x42a   : > { %v2836_v36 = vpop.eup %2835  ;;  %2845 = vlog2.f32 %v1810_v4  ;;  %v1819_v19 = vadd.f32 1.0, %v2834_v24  ;;  %v1814_v31 = vadd.f32 1.0, %v1813_v16  ;;  %v1960_v55 = vand.u32 2147483647, %v2832_v45 }
 0x42b   : > { %2847 = vlog2.f32 %v1954_v14  ;;  %v1822_v9 = vmul.f32 -0.5, %v2834_v24  ;;  %v2838_v33 = vpop.eup %2837  ;;  %v1977_v59 = vmul.f32 %v2828_v6, %v1976_v47  ;;  %v1963_v41 = vadd.f32 1.0, %v2836_v36  ;;  %v4009_v29 = vpop.permute.xlu0 %1431 }
 0x42c   : > { %2849 = vlog2.f32 %v1819_v19  ;;  %v3936_v27 = vadd.f32 %v1616_v11, %v1583_v37  ;;  %v3938_v51 = vpop.eup %2839  ;;  %v1958_v56 = vadd.f32 1.0, %v1957_v48  ;;  %v1825_v1 = vand.u32 2147483647, %v2834_v24 }
 0x42d   : > { %v1823_v60 = vadd.f32 1.0, %v1822_v9  ;;  %v1966_v20 = vmul.f32 -0.5, %v2836_v36  ;;  %2851 = vlog2.f32 %v1963_v41  ;;  %v1969_v22 = vand.u32 2147483647, %v2836_v36 }
 0x42e   : > { %v1801_v61 = vadd.f32 1.0, %v2838_v33  ;;  %v1804_v15 = vmul.f32 -0.5, %v2838_v33  ;;  %v1815_v28 = vmul.f32 %v2830_v21, %v1814_v31  ;;  %vm3941_vm6 = vcmp.lt.f32.partialorder %v1816_v63, 0.0004427343 }
 0x42f   : > { %vm3945_vm7 = vcmp.lt.f32.partialorder %v1960_v55, 0.0004427343  ;;  %v1967_v6 = vadd.f32 1.0, %v1966_v20  ;;  %v1807_v46 = vand.u32 2147483647, %v2838_v33  ;;  %v1945_v54 = vadd.f32 1.0, %v3938_v51 }
 0x430   : > { %v2842_v49 = vpop.eup %2841  ;;  %2853 = vlog2.f32 %v1801_v61  ;;  %v1959_v8 = vmul.f32 %v2832_v45, %v1958_v56  ;;  %vm3952_vm10 = vcmp.lt.f32.partialorder %v1825_v1, 0.0004427343  ;;  %v1805_v52 = vadd.f32 1.0, %v1804_v15 }
 0x431   : > { %v2844_v53 = vpop.eup %2843  ;;  %v1830_v57 = vmul.f32 0.6931472, %v2842_v49  ;;  %v1824_v21 = vmul.f32 %v2834_v24, %v1823_v60  ;;  %vm3958_vm11 = vcmp.lt.f32.partialorder %v1969_v22, 0.0004427343  ;;  %2855 = vlog2.f32 %v1945_v54 }
 0x432   : > { %v1974_v58 = vmul.f32 0.6931472, %v2844_v53  ;;  %v1948_v16 = vmul.f32 -0.5, %v3938_v51  ;;  %v3969_v37 = vadd.f32 %v1632_v0, %v1599_v38  ;;  %v1968_v48 = vmul.f32 %v2836_v36, %v1967_v6  ;;  %v1630_v0 = vld [vmem:[#allocation3 + $0xa8] sm:$0xff] }
 0x433   : > { %v1836_v13 = vsel %vm3922_vm1, %v1833_v40, %v1830_v57  ;;  %v1412_v40 = vpop.permute.xlu1 %1411  ;;  %vm3978_vm13 = vcmp.lt.f32.partialorder %v1807_v46, 0.0004427343  ;;  %v1806_v63 = vmul.f32 %v2838_v33, %v1805_v52  ;;  %v1712_v55 = vmin.f32 %v3936_v27, 20.0 }
 0x434   : > { %v1980_v4 = vsel %vm3927_vm3, %v1977_v59, %v1974_v58  ;;  %v2092_v45 = vsel %vm1676_vm2, %v3877_v30, %v1836_v13  ;;  %v2846_v24 = vpop.eup %2845  ;;  %v1728_v36 = vmin.f32 %v3969_v37, 20.0  ;;  %v1469_v9 = vmul.f32 %v1412_v40, %v3547_v18  ;;  %v1615_v13 = vld [vmem:[#allocation3 + $0x30] sm:$0xff] }
 0x435   : > { %v2108_v3 = vsel %vm1692_vm4, %v3879_v26, %v1980_v4  ;;  %v3976_v14 = vsel %vm2123_vm0, %v2092_v45, 0.0  ;;  %v2848_v30 = vpop.eup %2847  ;;  %v1812_v35 = vmul.f32 0.6931472, %v2846_v24  ;;  %v1951_v26 = vand.u32 2147483647, %v3938_v51 }
 0x436   : > { %v3984_v38 = vsel %vm2123_vm0, %v2108_v3, 0.0  ;;  %v2850_v19 = vpop.eup %2849  ;;  %v1956_v31 = vmul.f32 0.6931472, %v2848_v30  ;;  %v1949_v56 = vadd.f32 1.0, %v1948_v16  ;;  %v1485_v60 = vmul.f32 %v1412_v40, %v3603_v42  ;;  %v1631_v16 = vld [vmem:[#allocation3 + $0xb0] sm:$0xff]  ;;  %2166 = vst [vmem:[#allocation11 + $0x18] sm:$0xff] (!%p2473_p2), %v3976_v14 }
 0x437   : > { %v1818_v59 = vsel %vm3941_vm6, %v1815_v28, %v1812_v35  ;;  %v1821_v41 = vmul.f32 0.6931472, %v2850_v19  ;;  %v2852_v33 = vpop.eup %2851  ;;  %v1751_v22 = vmul.f32 1.442695, %v1712_v55  ;;  %v1783_v61 = vmul.f32 1.442695, %v1728_v36  ;;  %v1529_v53 = vpop.permute.xlu1 %1528 }
 0x438   : > { %v1962_v1 = vsel %vm3945_vm7, %v1959_v8, %v1956_v31  ;;  %v2090_v20 = vsel %vm1674_vm5, %v3887_v5, %v1818_v59  ;;  %v1965_v49 = vmul.f32 0.6931472, %v2852_v33  ;;  %v1614_v28 = vld [vmem:[#allocation3 + $0x28] sm:$0xff]  ;;  %v1581_v6 = vadd.f32 %v3907_v39, %v1469_v9  ;;  %v1620_v55 = vld [vmem:[#allocation3 + $0x58] sm:$0xff]  ;;  %2182 = vst [vmem:[#allocation11 + $0x98] sm:$0xff] (!%p2473_p2), %v3984_v38 }
 0x439   : > { %v2106_v18 = vsel %vm1690_vm8, %v3889_v50, %v1962_v1  ;;  %v4005_v15 = vsel %vm2123_vm0, %v2090_v20, 0.0  ;;  %v1827_v42 = vsel %vm3952_vm10, %v1824_v21, %v1821_v41  ;;  %2857 = vpow2.f32 %v1751_v22  ;;  %v1636_v36 = vld [vmem:[#allocation3 + $0xd8] sm:$0xff]  ;;  %v4747_v1 = vld [vmem:[#allocation25_spill] sm:$0xff] }
 0x43a   : > { %v2854_v62 = vpop.eup %2853  ;;  %v4013_v5 = vsel %vm2123_vm0, %v2106_v18, 0.0  ;;  %v2091_v50 = vsel %vm1675_vm9, %v3891_v17, %v1827_v42  ;;  %v1971_v57 = vsel %vm3958_vm11, %v1968_v48, %v1965_v49  ;;  %2859 = vpow2.f32 %v1783_v61  ;;  %2164 = vst [vmem:[#allocation11 + $0x8] sm:$0xff] (!%p2473_p2), %v4005_v15 }
 0x43b   : > { %v4023_v46 = vsel %vm2123_vm0, %v2091_v50, 0.0  ;;  %v1803_v54 = vmul.f32 0.6931472, %v2854_v62  ;;  %v2856_v58 = vpop.eup %2855  ;;  %v2107_v8 = vsel %vm1691_vm12, %v3893_v2, %v1971_v57  ;;  %v1950_v17 = vmul.f32 %v3938_v51, %v1949_v56  ;;  %v1519_v41 = vpop.permute.xlu1 %1518  ;;  %v1613_v62 = vld [vmem:[#allocation3 + $0x20] sm:$0xff]  ;;  %2180 = vst [vmem:[#allocation11 + $0x88] sm:$0xff] (!%p2473_p2), %v4013_v5 }
 0x43c   : > { %v1597_v32 = vadd.f32 %v3907_v39, %v1485_v60  ;;  %v4030_v52 = vadd.f32 %v1614_v28, %v1581_v6  ;;  %v4034_v21 = vsel %vm2123_vm0, %v2107_v8, 0.0  ;;  %v1947_v4 = vmul.f32 0.6931472, %v2856_v58  ;;  %v4746_v60 = vld [vmem:[#allocation17_spill] sm:$0xff]  ;;  %2165 = vst [vmem:[#allocation11 + $0x10] sm:$0xff] (!%p2473_p2), %v4023_v46 }
 0x43d   : > { %v1809_v47 = vsel %vm3978_vm13, %v1806_v63, %v1803_v54  ;;  %v1582_v45 = vadd.f32 %v1529_v53, %v3914_v10  ;;  %vm1952_vm1 = vcmp.lt.f32.partialorder %v1951_v26, 0.0004427343  ;;  %v1598_v3 = vadd.f32 %v1529_v53, %v3917_v34  ;;  %v1554_v10 = vpop.permute.xlu0 %1553  ;;  %v1629_v53 = vld [vmem:[#allocation3 + $0xa0] sm:$0xff]  ;;  %2181 = vst [vmem:[#allocation11 + $0x90] sm:$0xff] (!%p2473_p2), %v4034_v21 }
 0x43e   : > { %v2089_v2 = vsel %vm1673_vm14, %v3899_v23, %v1809_v47  ;;  %v4042_v51 = vadd.f32 %v1630_v0, %v1597_v32  ;;  %v1710_v39 = vmin.f32 %v4030_v52, 20.0  ;;  %v1953_v40 = vsel %vm1952_vm1, %v1950_v17, %v1947_v4  ;;  %v4745_v23 = vld [vmem:[#allocation28_spill] sm:$0xff] }
 0x43f   : > { %v4047_v24 = vsel %vm2123_vm0, %v2089_v2, 0.0  ;;  %v4050_v48 = vadd.f32 %v1615_v13, %v1582_v45  ;;  %v2105_v11 = vsel %vm1689_vm15, %v3901_v43, %v1953_v40  ;;  %v1491_v30 = vmul.f32 %v4745_v23, %v3919_v44 }
 0x440   : > { %v1726_v35 = vmin.f32 %v4042_v51, 20.0  ;;  %v1747_v63 = vmul.f32 1.442695, %v1710_v39  ;;  %v4060_v26 = vsel %vm2123_vm0, %v2105_v11, 0.0  ;;  %v4062_v19 = vadd.f32 %v1631_v16, %v1598_v3  ;;  %v4750_v3 = vld [vmem:[#allocation20_spill] sm:$0xff]  ;;  %v4751_v11 = vld [vmem:[#allocation29_spill] sm:$0xff] }
 0x441   : > { %v1711_v34 = vmin.f32 %v4050_v48, 20.0  ;;  %v1587_v43 = vadd.f32 %v1554_v10, %v3933_v12  ;;  %v1603_v9 = vadd.f32 %v1554_v10, %v1491_v30  ;;  %v1468_v33 = vmul.f32 %v3905_v7, %v4746_v60  ;;  %v1544_v30 = vpop.permute.xlu0 %1543  ;;  %2163 = vst [vmem:[#allocation11] sm:$0xff] (!%p2473_p2), %v4047_v24  ;;  %2179 = vst [vmem:[#allocation11 + $0x80] sm:$0xff] (!%p2473_p2), %v4060_v26 }
 0x442   : > { %2861 = vpow2.f32 %v1747_v63  ;;  %v1779_v31 = vmul.f32 1.442695, %v1726_v35  ;;  %v1727_v44 = vmin.f32 %v4062_v19, 20.0  ;;  %v1484_v20 = vmul.f32 %v3905_v7, %v4747_v1 }
 0x443   : > { %v1749_v59 = vmul.f32 1.442695, %v1711_v34  ;;  %v2858_v56 = vpop.eup %2857  ;;  %v4071_v18 = vadd.f32 %v1620_v55, %v1587_v43  ;;  %v4073_v42 = vadd.f32 %v1636_v36, %v1603_v9  ;;  %v1580_v28 = vadd.f32 %v1519_v41, %v1468_v33 }
 0x444   : > { %2863 = vpow2.f32 %v1779_v31  ;;  %v2860_v22 = vpop.eup %2859  ;;  %v1864_v61 = vadd.f32 1.0, %v2858_v56  ;;  %v1781_v49 = vmul.f32 1.442695, %v1727_v44  ;;  %v1596_v50 = vadd.f32 %v1519_v41, %v1484_v20 }
 0x445   : > { %2865 = vpow2.f32 %v1749_v59  ;;  %v2008_v12 = vadd.f32 1.0, %v2860_v22  ;;  %v1867_v6 = vmul.f32 -0.5, %v2858_v56  ;;  %v2011_v57 = vmul.f32 -0.5, %v2860_v22 }
 0x446   : > { %2867 = vlog2.f32 %v1864_v61  ;;  %v1716_v7 = vmin.f32 %v4071_v18, 20.0  ;;  %v1732_v54 = vmin.f32 %v4073_v42, 20.0  ;;  %v1870_v0 = vand.u32 2147483647, %v2858_v56 }
 0x447   : > { %2869 = vlog2.f32 %v2008_v12  ;;  %v4077_v58 = vadd.f32 %v1613_v62, %v1580_v28  ;;  %v4079_v32 = vadd.f32 %v1629_v53, %v1596_v50  ;;  %vm1680_vm2 = vcmp.gt.f32.partialorder %v3936_v27, 20.0 }
 0x448   : > { %2871 = vpow2.f32 %v1781_v49  ;;  %v1759_v8 = vmul.f32 1.442695, %v1716_v7  ;;  %v1791_v17 = vmul.f32 1.442695, %v1732_v54  ;;  %v1868_v47 = vadd.f32 1.0, %v1867_v6  ;;  %v1618_v6 = vld [vmem:[#allocation3 + $0x48] sm:$0xff] }
 0x449   : > { %v2014_v4 = vand.u32 2147483647, %v2860_v22  ;;  %v1709_v45 = vmin.f32 %v4077_v58, 20.0  ;;  %vm1696_vm3 = vcmp.gt.f32.partialorder %v3969_v37, 20.0  ;;  %v2012_v2 = vadd.f32 1.0, %v2011_v57 }
 0x44a   : > { %2873 = vpow2.f32 %v1759_v8  ;;  %vm4089_vm4 = vcmp.lt.f32.partialorder %v1870_v0, 0.0004427343  ;;  %v1473_v10 = vmul.f32 %v4009_v29, %v4750_v3  ;;  %v1489_v23 = vmul.f32 %v4009_v29, %v4751_v11  ;;  %v4118_v0 = vpop.permute.xlu1 %1436  ;;  %v4756_v11 = vld [vmem:[#allocation18_spill] sm:$0xff] }
 0x44b   : > { %2875 = vpow2.f32 %v1791_v17  ;;  %v1725_v34 = vmin.f32 %v4079_v32, 20.0  ;;  %v1745_v31 = vmul.f32 1.442695, %v1709_v45  ;;  %v1869_v55 = vmul.f32 %v2858_v56, %v1868_v47 }
 0x44c   : > { %v4081_v13 = vpop.eup %2861  ;;  %vm4099_vm5 = vcmp.lt.f32.partialorder %v2014_v4, 0.0004427343  ;;  %v2013_v59 = vmul.f32 %v2860_v22, %v2012_v2  ;;  %v1585_v41 = vadd.f32 %v1544_v30, %v1473_v10  ;;  %v1601_v20 = vadd.f32 %v1544_v30, %v1489_v23  ;;  %v1634_v4 = vld [vmem:[#allocation3 + $0xc8] sm:$0xff] }
 0x44d   : > { %v1846_v39 = vadd.f32 1.0, %v4081_v13  ;;  %v1849_v43 = vmul.f32 -0.5, %v4081_v13  ;;  %v1852_v12 = vand.u32 2147483647, %v4081_v13  ;;  %v1777_v49 = vmul.f32 1.442695, %v1725_v34 }
 0x44e   : > { %v4087_v16 = vpop.eup %2863  ;;  %vm1678_vm6 = vcmp.gt.f32.partialorder %v4030_v52, 20.0  ;;  %vm1694_vm7 = vcmp.gt.f32.partialorder %v4042_v51, 20.0  ;;  %vm1679_vm8 = vcmp.gt.f32.partialorder %v4050_v48, 20.0  ;;  %v4148_v23 = vmul.f32 %v4756_v11, %v4118_v0 }
 0x44f   : > { %v2866_v35 = vpop.eup %2865  ;;  %2877 = vlog2.f32 %v1846_v39  ;;  %v1990_v63 = vadd.f32 1.0, %v4087_v16  ;;  %v1993_v29 = vmul.f32 -0.5, %v4087_v16  ;;  %v1850_v22 = vadd.f32 1.0, %v1849_v43 }
 0x450   : > { %v1855_v9 = vadd.f32 1.0, %v2866_v35  ;;  %v2868_v44 = vpop.eup %2867  ;;  %v1858_v1 = vmul.f32 -0.5, %v2866_v35  ;;  %v1996_v62 = vand.u32 2147483647, %v4087_v16  ;;  %v1861_v54 = vand.u32 2147483647, %v2866_v35 }
 0x451   : > { %2879 = vlog2.f32 %v1990_v63  ;;  %v2870_v60 = vpop.eup %2869  ;;  %v1866_v33 = vmul.f32 0.6931472, %v2868_v44  ;;  %v1994_v7 = vadd.f32 1.0, %v1993_v29  ;;  %v1851_v40 = vmul.f32 %v4081_v13, %v1850_v22 }
 0x452   : > { %2881 = vlog2.f32 %v1855_v9  ;;  %v4105_v61 = vpop.eup %2871  ;;  %v2010_v56 = vmul.f32 0.6931472, %v2870_v60  ;;  %v1859_v47 = vadd.f32 1.0, %v1858_v1  ;;  %vm4141_vm9 = vcmp.lt.f32.partialorder %v1852_v12, 0.0004427343 }
 0x453   : > { %2883 = vpow2.f32 %v1745_v31  ;;  %v1872_v28 = vsel %vm4089_vm4, %v1869_v55, %v1866_v33  ;;  %v1999_v50 = vadd.f32 1.0, %v4105_v61  ;;  %v2002_v2 = vmul.f32 -0.5, %v4105_v61  ;;  %v4161_v55 = vpop.permute.xlu0 %1461 }
 0x454   : > { %v2016_v53 = vsel %vm4099_vm5, %v2013_v59, %v2010_v56  ;;  %v2096_v57 = vsel %vm1680_vm2, %v3936_v27, %v1872_v28  ;;  %v4128_v45 = vpop.eup %2873  ;;  %vm4150_vm10 = vcmp.lt.f32.partialorder %v1996_v62, 0.0004427343  ;;  %vm4154_vm11 = vcmp.lt.f32.partialorder %v1861_v54, 0.0004427343 }
 0x455   : > { %v2112_v8 = vsel %vm1696_vm3, %v3969_v37, %v2016_v53  ;;  %v4125_v17 = vsel %vm2123_vm0, %v2096_v57, 0.0  ;;  %2885 = vlog2.f32 %v1999_v50  ;;  %v4136_v37 = vadd.f32 %v1618_v6, %v1585_v41  ;;  %v4138_v39 = vpop.eup %2875  ;;  %v4185_v53 = vpop.permute.xlu1 %1426 }
 0x456   : > { %v4132_v27 = vsel %vm2123_vm0, %v2112_v8, 0.0  ;;  %2887 = vpow2.f32 %v1777_v49  ;;  %v1900_v10 = vadd.f32 1.0, %v4128_v45  ;;  %v2044_v13 = vadd.f32 1.0, %v4138_v39  ;;  %2170 = vst [vmem:[#allocation11 + $0x38] sm:$0xff] (!%p2473_p2), %v4125_v17 }
 0x457   : > { %v4159_v31 = vadd.f32 %v1634_v4, %v1601_v20  ;;  %v1995_v43 = vmul.f32 %v4087_v16, %v1994_v7  ;;  %v1860_v9 = vmul.f32 %v2866_v35, %v1859_v47  ;;  %vm1695_vm12 = vcmp.gt.f32.partialorder %v4062_v19, 20.0  ;;  %v1452_v54 = vpop.permute.xlu0 %1451  ;;  %2186 = vst [vmem:[#allocation11 + $0xb8] sm:$0xff] (!%p2473_p2), %v4132_v27 }
 0x458   : > { %2889 = vlog2.f32 %v1900_v10  ;;  %v2003_v59 = vadd.f32 1.0, %v2002_v2  ;;  %v2005_v29 = vand.u32 2147483647, %v4105_v61  ;;  %v1714_v41 = vmin.f32 %v4136_v37, 20.0 }
 0x459   : > { %v2878_v30 = vpop.eup %2877  ;;  %2891 = vlog2.f32 %v2044_v13  ;;  %v1903_v20 = vmul.f32 -0.5, %v4128_v45  ;;  %v1906_v16 = vand.u32 2147483647, %v4128_v45  ;;  %v2047_v49 = vmul.f32 -0.5, %v4138_v39  ;;  %v4769_v13 = vld [vmem:[#allocation19_spill] sm:$0xff] }
 0x45a   : > { %v1848_v36 = vmul.f32 0.6931472, %v2878_v30  ;;  %v1755_v28 = vmul.f32 1.442695, %v1714_v41  ;;  %v2050_v50 = vand.u32 2147483647, %v4138_v39  ;;  %v2004_v3 = vmul.f32 %v4105_v61, %v2003_v59 }
 0x45b   : > { %v2880_v44 = vpop.eup %2879  ;;  %vm1684_vm13 = vcmp.gt.f32.partialorder %v4071_v18, 20.0  ;;  %v1730_v7 = vmin.f32 %v4159_v31, 20.0  ;;  %vm1700_vm14 = vcmp.gt.f32.partialorder %v4073_v42, 20.0  ;;  %vm2006_vm15 = vcmp.lt.f32.partialorder %v2005_v29, 0.0004427343  ;;  %v1549_v29 = vpop.permute.xlu1 %1548 }
 0x45c   : > { %v2882_v60 = vpop.eup %2881  ;;  %v1854_v33 = vsel %vm4141_vm9, %v1851_v40, %v1848_v36  ;;  %v1992_v1 = vmul.f32 0.6931472, %v2880_v44  ;;  %2893 = vpow2.f32 %v1755_v28  ;;  %vm4209_vm1 = vcmp.lt.f32.partialorder %v1906_v16, 0.0004427343  ;;  %v1564_v16 = vpop.permute.xlu0 %1563  ;;  %v1619_v28 = vld [vmem:[#allocation3 + $0x50] sm:$0xff] }
 0x45d   : > { %v4171_v35 = vpop.eup %2883  ;;  %v2094_v56 = vsel %vm1678_vm6, %v4030_v52, %v1854_v33  ;;  %v1857_v12 = vmul.f32 0.6931472, %v2882_v60  ;;  %v2048_v30 = vadd.f32 1.0, %v2047_v49  ;;  %vm4215_vm2 = vcmp.lt.f32.partialorder %v2050_v50, 0.0004427343 }
 0x45e   : > { %v1998_v22 = vsel %vm4150_vm10, %v1995_v43, %v1992_v1  ;;  %v4181_v62 = vsel %vm2123_vm0, %v2094_v56, 0.0  ;;  %v1837_v6 = vadd.f32 1.0, %v4171_v35  ;;  %v1843_v61 = vand.u32 2147483647, %v4171_v35  ;;  %v4765_v1 = vld [vmem:[#allocation26_spill] sm:$0xff] }
 0x45f   : > { %v2110_v52 = vsel %vm1694_vm7, %v4042_v51, %v1998_v22  ;;  %v1863_v57 = vsel %vm4154_vm11, %v1860_v9, %v1857_v12  ;;  %v2886_v8 = vpop.eup %2885  ;;  %v1904_v51 = vadd.f32 1.0, %v1903_v20  ;;  %v1787_v36 = vmul.f32 1.442695, %v1730_v7  ;;  %v4766_v12 = vld [vmem:[#allocation24_spill] sm:$0xff]  ;;  %v1635_v22 = vld [vmem:[#allocation3 + $0xd0] sm:$0xff]  ;;  %2168 = vst [vmem:[#allocation11 + $0x28] sm:$0xff] (!%p2473_p2), %v4181_v62 }
 0x460   : > { %v4196_v47 = vsel %vm2123_vm0, %v2110_v52, 0.0  ;;  %v2095_v4 = vsel %vm1679_vm8, %v4050_v48, %v1863_v57  ;;  %2895 = vlog2.f32 %v1837_v6  ;;  %v4202_v2 = vpop.eup %2887  ;;  %v2001_v40 = vmul.f32 0.6931472, %v2886_v8  ;;  %v1617_v6 = vld [vmem:[#allocation3 + $0x40] sm:$0xff] }
 0x461   : > { %v4207_v10 = vsel %vm2123_vm0, %v2095_v4, 0.0  ;;  %v1840_v48 = vmul.f32 -0.5, %v4171_v35  ;;  %v1981_v63 = vadd.f32 1.0, %v4202_v2  ;;  %v1905_v44 = vmul.f32 %v4128_v45, %v1904_v51  ;;  %2184 = vst [vmem:[#allocation11 + $0xa8] sm:$0xff] (!%p2473_p2), %v4196_v47 }
 0x462   : > { %v2007_v34 = vsel %vm2006_vm15, %v2004_v3, %v2001_v40  ;;  %v2890_v43 = vpop.eup %2889  ;;  %v1984_v59 = vmul.f32 -0.5, %v4202_v2  ;;  %vm1677_vm3 = vcmp.gt.f32.partialorder %v4077_v58, 20.0  ;;  %v1490_v20 = vmul.f32 %v4765_v1, %v4118_v0  ;;  %2169 = vst [vmem:[#allocation11 + $0x30] sm:$0xff] (!%p2473_p2), %v4207_v10 }
 0x463   : > { %v2111_v9 = vsel %vm1695_vm12, %v4062_v19, %v2007_v34  ;;  %2897 = vlog2.f32 %v1981_v63  ;;  %v2892_v41 = vpop.eup %2891  ;;  %v1902_v33 = vmul.f32 0.6931472, %v2890_v43  ;;  %v2049_v45 = vmul.f32 %v4138_v39, %v2048_v30 }
 0x464   : > { %v4227_v60 = vsel %vm2123_vm0, %v2111_v9, 0.0  ;;  %2899 = vpow2.f32 %v1787_v36  ;;  %v2046_v19 = vmul.f32 0.6931472, %v2892_v41  ;;  %v1841_v56 = vadd.f32 1.0, %v1840_v48  ;;  %v4770_v36 = vld [vmem:[#allocation33_spill] sm:$0xff] }
 0x465   : > { %v1477_v49 = vmul.f32 %v1452_v54, %v4766_v12  ;;  %v1908_v50 = vsel %vm4209_vm1, %v1905_v44, %v1902_v33  ;;  %vm4236_vm4 = vcmp.lt.f32.partialorder %v1843_v61, 0.0004427343  ;;  %v1586_v52 = vadd.f32 %v1549_v29, %v4148_v23  ;;  %v1539_v44 = vpop.permute.xlu1 %1538  ;;  %v1638_v33 = vld [vmem:[#allocation3 + $0xe8] sm:$0xff]  ;;  %2185 = vst [vmem:[#allocation11 + $0xb0] sm:$0xff] (!%p2473_p2), %v4227_v60 }
 0x466   : > { %v1602_v57 = vadd.f32 %v1549_v29, %v1490_v20  ;;  %v2052_v0 = vsel %vm4215_vm2, %v2049_v45, %v2046_v19  ;;  %v2100_v39 = vsel %vm1684_vm13, %v4071_v18, %v1908_v50  ;;  %v1985_v7 = vadd.f32 1.0, %v1984_v59  ;;  %v4246_v4 = vpop.eup %2893  ;;  %v4771_v29 = vld [vmem:[#allocation27_spill] sm:$0xff] }
 0x467   : > { %v1589_v8 = vadd.f32 %v1564_v16, %v1477_v49  ;;  %v2116_v51 = vsel %vm1700_vm14, %v4073_v42, %v2052_v0  ;;  %v4253_v40 = vsel %vm2123_vm0, %v2100_v39, 0.0  ;;  %v4255_v23 = vadd.f32 %v1619_v28, %v1586_v52  ;;  %v1622_v42 = vld [vmem:[#allocation3 + $0x68] sm:$0xff] }
 0x468   : > { %v4257_v3 = vadd.f32 %v1635_v22, %v1602_v57  ;;  %v4261_v18 = vsel %vm2123_vm0, %v2116_v51, 0.0  ;;  %v1842_v30 = vmul.f32 %v4171_v35, %v1841_v56  ;;  %v1987_v48 = vand.u32 2147483647, %v4202_v2  ;;  %v4772_v57 = vld [vmem:[#allocation23_spill] sm:$0xff]  ;;  %2174 = vst [vmem:[#allocation11 + $0x58] sm:$0xff] (!%p2473_p2), %v4253_v40 }
 0x469   : > { %v1882_v63 = vadd.f32 1.0, %v4246_v4  ;;  %v1472_v61 = vmul.f32 %v4185_v53, %v4769_v13  ;;  %v1493_v43 = vmul.f32 %v1452_v54, %v4770_v36  ;;  %v1715_v9 = vmin.f32 %v4255_v23, 20.0  ;;  %v1624_v36 = vld [vmem:[#allocation3 + $0x78] sm:$0xff]  ;;  %2190 = vst [vmem:[#allocation11 + $0xd8] sm:$0xff] (!%p2473_p2), %v4261_v18 }
 0x46a   : > { %v2896_v11 = vpop.eup %2895  ;;  %v1986_v59 = vmul.f32 %v4202_v2, %v1985_v7  ;;  %v1488_v35 = vmul.f32 %v4185_v53, %v4771_v29  ;;  %v1731_v41 = vmin.f32 %v4257_v3, 20.0  ;;  %v4276_v45 = vadd.f32 %v1622_v42, %v1589_v8  ;;  %v1633_v7 = vld [vmem:[#allocation3 + $0xc0] sm:$0xff]  ;;  %v1574_v8 = vpop.permute.xlu0 %1573 }
 0x46b   : > { %v1839_v34 = vmul.f32 0.6931472, %v2896_v11  ;;  %2901 = vlog2.f32 %v1882_v63  ;;  %v1757_v20 = vmul.f32 1.442695, %v1715_v9  ;;  %v1605_v19 = vadd.f32 %v1564_v16, %v1493_v43  ;;  %v4298_v63 = vpop.permute.xlu1 %1456  ;;  %v1640_v43 = vld [vmem:[#allocation3 + $0xf8] sm:$0xff] }
 0x46c   : > { %v1885_v2 = vmul.f32 -0.5, %v4246_v4  ;;  %v1789_v12 = vmul.f32 1.442695, %v1731_v41  ;;  %v1584_v49 = vadd.f32 %v1539_v44, %v1472_v61  ;;  %vm1988_vm5 = vcmp.lt.f32.partialorder %v1987_v48, 0.0004427343 }
 0x46d   : > { %v1845_v1 = vsel %vm4236_vm4, %v1842_v30, %v1839_v34  ;;  %v2898_v54 = vpop.eup %2897  ;;  %2903 = vpow2.f32 %v1757_v20  ;;  %v4288_v16 = vadd.f32 %v1638_v33, %v1605_v19  ;;  %vm1693_vm6 = vcmp.gt.f32.partialorder %v4079_v32, 20.0  ;;  %v4773_v30 = vld [vmem:[#allocation32_spill] sm:$0xff] }
 0x46e   : > { %v2093_v56 = vsel %vm1677_vm3, %v4077_v58, %v1845_v1  ;;  %v4282_v53 = vpop.eup %2899  ;;  %v1983_v28 = vmul.f32 0.6931472, %v2898_v54  ;;  %2905 = vpow2.f32 %v1789_v12  ;;  %v1600_v58 = vadd.f32 %v1539_v44, %v1488_v35 }
 0x46f   : > { %v4286_v22 = vsel %vm2123_vm0, %v2093_v56, 0.0  ;;  %v2026_v50 = vadd.f32 1.0, %v4282_v53  ;;  %v1479_v0 = vmul.f32 %v4772_v57, %v4161_v55  ;;  %v1718_v39 = vmin.f32 %v4276_v45, 20.0  ;;  %v1447_v12 = vpop.permute.xlu1 %1446 }
 0x470   : > { %v1989_v52 = vsel %vm1988_vm5, %v1986_v59, %v1983_v28  ;;  %v1886_v11 = vadd.f32 1.0, %v1885_v2  ;;  %v1495_v48 = vmul.f32 %v4773_v30, %v4161_v55  ;;  %v1734_v34 = vmin.f32 %v4288_v16, 20.0  ;;  %2167 = vst [vmem:[#allocation11 + $0x20] sm:$0xff] (!%p2473_p2), %v4286_v22 }
 0x471   : > { %v2109_v51 = vsel %vm1693_vm6, %v4079_v32, %v1989_v52  ;;  %2907 = vlog2.f32 %v2026_v50  ;;  %v1763_v13 = vmul.f32 1.442695, %v1718_v39  ;;  %v4305_v61 = vadd.f32 %v1617_v6, %v1584_v49 }
 0x472   : > { %v4302_v42 = vsel %vm2123_vm0, %v2109_v51, 0.0  ;;  %v1888_v32 = vand.u32 2147483647, %v4246_v4  ;;  %v4308_v9 = vadd.f32 %v1633_v7, %v1600_v58  ;;  %v1591_v44 = vadd.f32 %v1574_v8, %v1479_v0 }
 0x473   : > { %v1607_v59 = vadd.f32 %v1574_v8, %v1495_v48  ;;  %v2029_v55 = vmul.f32 -0.5, %v4282_v53  ;;  %2909 = vpow2.f32 %v1763_v13  ;;  %v1795_v29 = vmul.f32 1.442695, %v1734_v34  ;;  %v1559_v34 = vpop.permute.xlu1 %1558  ;;  %2183 = vst [vmem:[#allocation11 + $0xa0] sm:$0xff] (!%p2473_p2), %v4302_v42 }
 0x474   : > { %v1713_v35 = vmin.f32 %v4305_v61, 20.0  ;;  %v1729_v33 = vmin.f32 %v4308_v9, 20.0  ;;  %v4313_v1 = vadd.f32 %v1624_v36, %v1591_v44  ;;  %v1887_v54 = vmul.f32 %v4246_v4, %v1886_v11 }
 0x475   : > { %v2902_v41 = vpop.eup %2901  ;;  %v4315_v20 = vadd.f32 %v1640_v43, %v1607_v59  ;;  %2911 = vpow2.f32 %v1795_v29  ;;  %vm1682_vm7 = vcmp.gt.f32.partialorder %v4136_v37, 20.0  ;;  %vm1889_vm8 = vcmp.lt.f32.partialorder %v1888_v32, 0.0004427343  ;;  %v4774_v32 = vld [vmem:[#allocation22_spill] sm:$0xff] }
 0x476   : > { %v1884_v19 = vmul.f32 0.6931472, %v2902_v41  ;;  %v1753_v56 = vmul.f32 1.442695, %v1713_v35  ;;  %v1720_v2 = vmin.f32 %v4313_v1, 20.0  ;;  %v2030_v50 = vadd.f32 1.0, %v2029_v55 }
 0x477   : > { %v2904_v49 = vpop.eup %2903  ;;  %v2032_v6 = vand.u32 2147483647, %v4282_v53  ;;  %v1785_v0 = vmul.f32 1.442695, %v1729_v33  ;;  %v1736_v4 = vmin.f32 %v4315_v20, 20.0  ;;  %vm1698_vm9 = vcmp.gt.f32.partialorder %v4159_v31, 20.0 }
 0x478   : > { %v1890_v28 = vsel %vm1889_vm8, %v1887_v54, %v1884_v19  ;;  %2913 = vpow2.f32 %v1753_v56  ;;  %v2906_v58 = vpop.eup %2905  ;;  %v1891_v57 = vadd.f32 1.0, %v2904_v49  ;;  %v1767_v51 = vmul.f32 1.442695, %v1720_v2  ;;  %v1621_v35 = vld [vmem:[#allocation3 + $0x60] sm:$0xff]  ;;  %v4775_v56 = vld [vmem:[#allocation31_spill] sm:$0xff] }
 0x479   : > { %v2098_v52 = vsel %vm1682_vm7, %v4136_v37, %v1890_v28  ;;  %v2035_v7 = vadd.f32 1.0, %v2906_v58  ;;  %v2031_v30 = vmul.f32 %v4282_v53, %v2030_v50  ;;  %vm2033_vm10 = vcmp.lt.f32.partialorder %v2032_v6, 0.0004427343 }
 0x47a   : > { %v4325_v39 = vsel %vm2123_vm0, %v2098_v52, 0.0  ;;  %2915 = vlog2.f32 %v1891_v57  ;;  %v1894_v37 = vmul.f32 -0.5, %v2904_v49  ;;  %v1799_v48 = vmul.f32 1.442695, %v1736_v4 }
 0x47b   : > { %v2908_v8 = vpop.eup %2907  ;;  %2917 = vlog2.f32 %v2035_v7  ;;  %v2038_v43 = vmul.f32 -0.5, %v2906_v58  ;;  %v1476_v44 = vmul.f32 %v1447_v12, %v4774_v32  ;;  %v1897_v55 = vand.u32 2147483647, %v2904_v49  ;;  %2172 = vst [vmem:[#allocation11 + $0x48] sm:$0xff] (!%p2473_p2), %v4325_v39 }
 0x47c   : > { %v2028_v11 = vmul.f32 0.6931472, %v2908_v8  ;;  %2919 = vpow2.f32 %v1785_v0  ;;  %vm1683_vm11 = vcmp.gt.f32.partialorder %v4255_v23, 20.0  ;;  %v2041_v33 = vand.u32 2147483647, %v2906_v58 }
 0x47d   : > { %v4329_v13 = vpop.eup %2909  ;;  %2921 = vpow2.f32 %v1767_v51  ;;  %v1588_v19 = vadd.f32 %v1559_v34, %v1476_v44  ;;  %vm1699_vm12 = vcmp.gt.f32.partialorder %v4257_v3, 20.0  ;;  %v1895_v54 = vadd.f32 1.0, %v1894_v37 }
 0x47e   : > { %v2034_v36 = vsel %vm2033_vm10, %v2031_v30, %v2028_v11  ;;  %v1918_v29 = vadd.f32 1.0, %v4329_v13  ;;  %2923 = vpow2.f32 %v1799_v48  ;;  %v1492_v2 = vmul.f32 %v1447_v12, %v4775_v56  ;;  %v4778_v12 = vld [vmem:[#allocation21_spill] sm:$0xff]  ;;  %v4779_v30 = vld [vmem:[#allocation30_spill] sm:$0xff] }
 0x47f   : > { %v2114_v59 = vsel %vm1698_vm9, %v4159_v31, %v2034_v36  ;;  %v4334_v53 = vpop.eup %2911  ;;  %v2039_v50 = vadd.f32 1.0, %v2038_v43  ;;  %v1921_v6 = vmul.f32 -0.5, %v4329_v13  ;;  %v1924_v52 = vand.u32 2147483647, %v4329_v13  ;;  %v1637_v48 = vld [vmem:[#allocation3 + $0xe0] sm:$0xff] }
 0x480   : > { %v4338_v41 = vsel %vm2123_vm0, %v2114_v59, 0.0  ;;  %2925 = vlog2.f32 %v1918_v29  ;;  %v2062_v31 = vadd.f32 1.0, %v4334_v53  ;;  %v4346_v57 = vadd.f32 %v1621_v35, %v1588_v19 }
 0x481   : > { %v2065_v0 = vmul.f32 -0.5, %v4334_v53  ;;  %v1604_v7 = vadd.f32 %v1559_v34, %v1492_v2  ;;  %vm4349_vm13 = vcmp.lt.f32.partialorder %v1897_v55, 0.0004427343  ;;  %v1478_v11 = vmul.f32 %v4778_v12, %v4298_v63  ;;  %2188 = vst [vmem:[#allocation11 + $0xc8] sm:$0xff] (!%p2473_p2), %v4338_v41 }
 0x482   : > { %v2914_v28 = vpop.eup %2913  ;;  %2927 = vlog2.f32 %v2062_v31  ;;  %v4357_v37 = vmul.f32 %v4779_v30, %v4298_v63  ;;  %v1896_v43 = vmul.f32 %v2904_v49, %v1895_v54  ;;  %vm4359_vm14 = vcmp.lt.f32.partialorder %v2041_v33, 0.0004427343  ;;  %v1569_v30 = vpop.permute.xlu1 %1568 }
 0x483   : > { %v1873_v4 = vadd.f32 1.0, %v2914_v28  ;;  %v1876_v51 = vmul.f32 -0.5, %v2914_v28  ;;  %v1717_v34 = vmin.f32 %v4346_v57, 20.0  ;;  %v2040_v55 = vmul.f32 %v2906_v58, %v2039_v50 }
 0x484   : > { %v2916_v36 = vpop.eup %2915  ;;  %vm1686_vm15 = vcmp.gt.f32.partialorder %v4276_v45, 20.0  ;;  %v1922_v29 = vadd.f32 1.0, %v1921_v6  ;;  %vm4365_vm1 = vcmp.lt.f32.partialorder %v1924_v52, 0.0004427343  ;;  %v2066_v33 = vadd.f32 1.0, %v2065_v0 }
 0x485   : > { %2929 = vlog2.f32 %v1873_v4  ;;  %v2918_v44 = vpop.eup %2917  ;;  %v1893_v59 = vmul.f32 0.6931472, %v2916_v36  ;;  %v2068_v19 = vand.u32 2147483647, %v4334_v53  ;;  %v4372_v54 = vadd.f32 %v1637_v48, %v1604_v7 }
 0x486   : > { %v4369_v63 = vpop.eup %2919  ;;  %v2037_v49 = vmul.f32 0.6931472, %v2918_v44  ;;  %vm1702_vm2 = vcmp.gt.f32.partialorder %v4288_v16, 20.0  ;;  %v1877_v56 = vadd.f32 1.0, %v1876_v51  ;;  %v1879_v2 = vand.u32 2147483647, %v2914_v28 }
 0x487   : > { %v4374_v31 = vpop.eup %2921  ;;  %v1899_v58 = vsel %vm4349_vm13, %v1896_v43, %v1893_v59  ;;  %v2017_v50 = vadd.f32 1.0, %v4369_v63  ;;  %v1761_v4 = vmul.f32 1.442695, %v1717_v34  ;;  %v1923_v12 = vmul.f32 %v4329_v13, %v1922_v29 }
 0x488   : > { %v2043_v6 = vsel %vm4359_vm14, %v2040_v55, %v2037_v49  ;;  %v2099_v52 = vsel %vm1683_vm11, %v4255_v23, %v1899_v58  ;;  %v1936_v0 = vadd.f32 1.0, %v4374_v31  ;;  %v4386_v7 = vpop.eup %2923  ;;  %vm1681_vm3 = vcmp.gt.f32.partialorder %v4305_v61, 20.0 }
 0x489   : > { %v2115_v8 = vsel %vm1699_vm12, %v4257_v3, %v2043_v6  ;;  %v4393_v51 = vsel %vm2123_vm0, %v2099_v52, 0.0  ;;  %2931 = vlog2.f32 %v2017_v50  ;;  %v2020_v36 = vmul.f32 -0.5, %v4369_v63  ;;  %v1639_v6 = vld [vmem:[#allocation3 + $0xf0] sm:$0xff] }
 0x48a   : > { %v2926_v23 = vpop.eup %2925  ;;  %v4399_v48 = vsel %vm2123_vm0, %v2115_v8, 0.0  ;;  %2933 = vlog2.f32 %v1936_v0  ;;  %v1733_v3 = vmin.f32 %v4372_v54, 20.0  ;;  %v2067_v32 = vmul.f32 %v4334_v53, %v2066_v33  ;;  %v1623_v33 = vld [vmem:[#allocation3 + $0x70] sm:$0xff]  ;;  %2173 = vst [vmem:[#allocation11 + $0x50] sm:$0xff] (!%p2473_p2), %v4393_v51 }
 0x48b   : > { %v1920_v43 = vmul.f32 0.6931472, %v2926_v23  ;;  %vm4404_vm4 = vcmp.lt.f32.partialorder %v2068_v19, 0.0004427343  ;;  %v2080_v13 = vadd.f32 1.0, %v4386_v7  ;;  %v1878_v59 = vmul.f32 %v2914_v28, %v1877_v56  ;;  %2189 = vst [vmem:[#allocation11 + $0xd0] sm:$0xff] (!%p2473_p2), %v4399_v48 }
 0x48c   : > { %v2928_v44 = vpop.eup %2927  ;;  %vm4409_vm5 = vcmp.lt.f32.partialorder %v1879_v2, 0.0004427343  ;;  %2935 = vpow2.f32 %v1761_v4  ;;  %v1590_v29 = vadd.f32 %v1569_v30, %v1478_v11  ;;  %v1939_v53 = vmul.f32 -0.5, %v4374_v31 }
 0x48d   : > { %v1926_v49 = vsel %vm4365_vm1, %v1923_v12, %v1920_v43  ;;  %v2064_v58 = vmul.f32 0.6931472, %v2928_v44  ;;  %2937 = vlog2.f32 %v2080_v13  ;;  %v2021_v28 = vadd.f32 1.0, %v2020_v36 }
 0x48e   : > { %v2102_v50 = vsel %vm1686_vm15, %v4276_v45, %v1926_v49  ;;  %v2023_v56 = vand.u32 2147483647, %v4369_v63  ;;  %v1793_v2 = vmul.f32 1.442695, %v1733_v3  ;;  %v1606_v0 = vadd.f32 %v1569_v30, %v4357_v37 }
 0x48f   : > { %v2930_v19 = vpop.eup %2929  ;;  %v2070_v11 = vsel %vm4404_vm4, %v2067_v32, %v2064_v58  ;;  %v4424_v35 = vsel %vm2123_vm0, %v2102_v50, 0.0  ;;  %v2083_v45 = vmul.f32 -0.5, %v4386_v7  ;;  %v4431_v8 = vadd.f32 %v1623_v33, %v1590_v29 }
 0x490   : > { %v1875_v52 = vmul.f32 0.6931472, %v2930_v19  ;;  %v2118_v4 = vsel %vm1702_vm2, %v4288_v16, %v2070_v11  ;;  %2939 = vpow2.f32 %v1793_v2  ;;  %v1940_v36 = vadd.f32 1.0, %v1939_v53  ;;  %2176 = vst [vmem:[#allocation11 + $0x68] sm:$0xff] (!%p2473_p2), %v4424_v35 }
 0x491   : > { %v4435_v12 = vsel %vm2123_vm0, %v2118_v4, 0.0  ;;  %v4439_v3 = vadd.f32 %v1639_v6, %v1606_v0  ;;  %v1942_v16 = vand.u32 2147483647, %v4374_v31  ;;  %v1719_v30 = vmin.f32 %v4431_v8, 20.0 }
 0x492   : > { %v1881_v23 = vsel %vm4409_vm5, %v1878_v59, %v1875_v52  ;;  %vm1697_vm6 = vcmp.gt.f32.partialorder %v4308_v9, 20.0  ;;  %v2022_v59 = vmul.f32 %v4369_v63, %v2021_v28  ;;  %v2084_v55 = vadd.f32 1.0, %v2083_v45  ;;  %2192 = vst [vmem:[#allocation11 + $0xe8] sm:$0xff] (!%p2473_p2), %v4435_v12 }
 0x493   : > { %v2097_v37 = vsel %vm1681_vm3, %v4305_v61, %v1881_v23  ;;  %v2932_v43 = vpop.eup %2931  ;;  %v1735_v34 = vmin.f32 %v4439_v3, 20.0  ;;  %v1765_v29 = vmul.f32 1.442695, %v1719_v30  ;;  %vm2024_vm7 = vcmp.lt.f32.partialorder %v2023_v56, 0.0004427343 }
 0x494   : > { %v4449_v32 = vsel %vm2123_vm0, %v2097_v37, 0.0  ;;  %v2934_v13 = vpop.eup %2933  ;;  %v2019_v44 = vmul.f32 0.6931472, %v2932_v43  ;;  %v1941_v49 = vmul.f32 %v4374_v31, %v1940_v36  ;;  %v2086_v58 = vand.u32 2147483647, %v4386_v7 }
 0x495   : > { %v1938_v61 = vmul.f32 0.6931472, %v2934_v13  ;;  %vm1943_vm8 = vcmp.lt.f32.partialorder %v1942_v16, 0.0004427343  ;;  %2941 = vpow2.f32 %v1765_v29  ;;  %v1797_v19 = vmul.f32 1.442695, %v1735_v34 }
 0x496   : > { %v2936_v53 = vpop.eup %2935  ;;  %v2025_v33 = vsel %vm2024_vm7, %v2022_v59, %v2019_v44  ;;  %vm1688_vm9 = vcmp.gt.f32.partialorder %v4313_v1, 20.0  ;;  %v2085_v6 = vmul.f32 %v4386_v7, %v2084_v55  ;;  %vm2087_vm10 = vcmp.lt.f32.partialorder %v2086_v58, 0.0004427343  ;;  %2171 = vst [vmem:[#allocation11 + $0x40] sm:$0xff] (!%p2473_p2), %v4449_v32 }
 0x497   : > { %v2938_v50 = vpop.eup %2937  ;;  %v2113_v2 = vsel %vm1697_vm6, %v4308_v9, %v2025_v33  ;;  %v1944_v63 = vsel %vm1943_vm8, %v1941_v49, %v1938_v61  ;;  %v1909_v28 = vadd.f32 1.0, %v2936_v53  ;;  %vm1704_vm11 = vcmp.gt.f32.partialorder %v4315_v20, 20.0 }
 0x498   : > { %v4461_v56 = vsel %vm2123_vm0, %v2113_v2, 0.0  ;;  %v2082_v31 = vmul.f32 0.6931472, %v2938_v50  ;;  %v2104_v11 = vsel %vm1688_vm9, %v4313_v1, %v1944_v63  ;;  %v1912_v7 = vmul.f32 -0.5, %v2936_v53 }
 0x499   : > { %v4467_v52 = vsel %vm2123_vm0, %v2104_v11, 0.0  ;;  %2943 = vlog2.f32 %v1909_v28  ;;  %v1915_v16 = vand.u32 2147483647, %v2936_v53  ;;  %vm1685_vm13 = vcmp.gt.f32.partialorder %v4346_v57, 20.0  ;;  %2187 = vst [vmem:[#allocation11 + $0xc0] sm:$0xff] (!%p2473_p2), %v4461_v56 }
 0x49a   : > { %v2940_v9 = vpop.eup %2939  ;;  %v2088_v0 = vsel %vm2087_vm10, %v2085_v6, %v2082_v31  ;;  %2945 = vpow2.f32 %v1797_v19  ;;  %v1913_v36 = vadd.f32 1.0, %v1912_v7  ;;  %vm1701_vm15 = vcmp.gt.f32.partialorder %v4372_v54, 20.0  ;;  %2178 = vst [vmem:[#allocation11 + $0x78] sm:$0xff] (!%p2473_p2), %v4467_v52 }
 0x49b   : > { %v2120_v4 = vsel %vm1704_vm11, %v4315_v20, %v2088_v0  ;;  %v2053_v45 = vadd.f32 1.0, %v2940_v9  ;;  %v2056_v37 = vmul.f32 -0.5, %v2940_v9  ;;  %vm1916_vm12 = vcmp.lt.f32.partialorder %v1915_v16, 0.0004427343 }
 0x49c   : > { %v4473_v23 = vsel %vm2123_vm0, %v2120_v4, 0.0  ;;  %v1914_v44 = vmul.f32 %v2936_v53, %v1913_v36  ;;  %v2059_v20 = vand.u32 2147483647, %v2940_v9  ;;  %vm1687_vm2 = vcmp.gt.f32.partialorder %v4431_v8, 20.0 }
 0x49d   : > { %2947 = vlog2.f32 %v2053_v45  ;;  %v2057_v59 = vadd.f32 1.0, %v2056_v37  ;;  %vm1703_vm4 = vcmp.gt.f32.partialorder %v4439_v3, 20.0  ;;  %2194 = vst [vmem:[#allocation11 + $0xf8] sm:$0xff] (!%p2473_p2), %v4473_v23 }
 0x49e   : > { %vm2060_vm14 = vcmp.lt.f32.partialorder %v2059_v20, 0.0004427343 }
 0x49f   : > { %v2942_v1 = vpop.eup %2941  ;;  %v2058_v19 = vmul.f32 %v2940_v9, %v2057_v59 }
 0x4a0   : > { %v1927_v30 = vadd.f32 1.0, %v2942_v1  ;;  %v1930_v61 = vmul.f32 -0.5, %v2942_v1  ;;  %v1933_v31 = vand.u32 2147483647, %v2942_v1 }
 0x4a2   : > { %2949 = vlog2.f32 %v1927_v30  ;;  %v1931_v2 = vadd.f32 1.0, %v1930_v61  ;;  %vm1934_vm1 = vcmp.lt.f32.partialorder %v1933_v31, 0.0004427343 }
 0x4a3   : > { %v2944_v43 = vpop.eup %2943 }
 0x4a4   : > { %v2946_v34 = vpop.eup %2945  ;;  %v1911_v13 = vmul.f32 0.6931472, %v2944_v43  ;;  %v1932_v9 = vmul.f32 %v2942_v1, %v1931_v2 }
 0x4a5   : > { %v2071_v55 = vadd.f32 1.0, %v2946_v34  ;;  %v2074_v63 = vmul.f32 -0.5, %v2946_v34  ;;  %v2077_v4 = vand.u32 2147483647, %v2946_v34 }
 0x4a6   : > { %v1917_v29 = vsel %vm1916_vm12, %v1914_v44, %v1911_v13 }
 0x4a7   : > { %v2948_v49 = vpop.eup %2947  ;;  %v2101_v58 = vsel %vm1685_vm13, %v4346_v57, %v1917_v29  ;;  %2951 = vlog2.f32 %v2071_v55  ;;  %v2075_v0 = vadd.f32 1.0, %v2074_v63  ;;  %vm2078_vm3 = vcmp.lt.f32.partialorder %v2077_v4, 0.0004427343 }
 0x4a8   : > { %v2055_v33 = vmul.f32 0.6931472, %v2948_v49  ;;  %v4479_v50 = vsel %vm2123_vm0, %v2101_v58, 0.0 }
 0x4a9   : > { %v2076_v16 = vmul.f32 %v2946_v34, %v2075_v0  ;;  %2175 = vst [vmem:[#allocation11 + $0x60] sm:$0xff] (!%p2473_p2), %v4479_v50 }
 0x4aa   : > { %v2061_v53 = vsel %vm2060_vm14, %v2058_v19, %v2055_v33 }
 0x4ab   : > { %v2117_v28 = vsel %vm1701_vm15, %v4372_v54, %v2061_v53 }
 0x4ac   : > { %v4485_v6 = vsel %vm2123_vm0, %v2117_v28, 0.0  ;;  %v2950_v57 = vpop.eup %2949 }
 0x4ad   : > { %v1929_v11 = vmul.f32 0.6931472, %v2950_v57  ;;  %2191 = vst [vmem:[#allocation11 + $0xe0] sm:$0xff] (!%p2473_p2), %v4485_v6 }
 0x4af   : > { %v1935_v45 = vsel %vm1934_vm1, %v1932_v9, %v1929_v11 }
 0x4b0   : > { %v2103_v36 = vsel %vm1687_vm2, %v4431_v8, %v1935_v45  ;;  %2161 = sbr.rel (%p2473_p2) target bundleno = 1208 (0x4b8), region = 68 }
 0x4b1   : > { %v2952_v7 = vpop.eup %2951  ;;  %v4491_v54 = vsel %vm2123_vm0, %v2103_v36, 0.0 }
 0x4b2   : > { %v2073_v37 = vmul.f32 0.6931472, %v2952_v7  ;;  %2177 = vst [vmem:[#allocation11 + $0x70] sm:$0xff] (!%p2473_p2), %v4491_v54 }
 0x4b4   : > { %v2079_v30 = vsel %vm2078_vm3, %v2076_v16, %v2073_v37 }
 0x4b5   : > { %v2119_v1 = vsel %vm1703_vm4, %v4439_v3, %v2079_v30 }
 0x4b6   : > { %v4497_v43 = vsel %vm2123_vm0, %v2119_v1, 0.0 }
 0x4b7   : > { %2193 = vst [vmem:[#allocation11 + $0xf0] sm:$0xff] %v4497_v43 }
 0x4b8 PF: > { %p2195_p12 = scmp.eq.s32.totalorder %s4800_s18, 0  ;;  %p2196_p3 = scmp.lt.s32.totalorder %s3179_s21, 2 }
 0x4ba   : > { %p2197_p8 = pnand %p2196_p3, %p2195_p12 }
 0x4bb   : > { %v2201_v25 = vpack.c.bf16 (!%p2197_p8), %v4005_v15, %v4047_v24  ;;  %v2202_v8 = vpack.c.bf16 (!%p2197_p8), %v3976_v14, %v4023_v46  ;;  %v2203_v3 = vpack.c.bf16 (!%p2197_p8), %v4181_v62, %v4286_v22  ;;  %v2204_v34 = vpack.c.bf16 (!%p2197_p8), %v4125_v17, %v4207_v10 }
 0x4bc   : > { %2200 = sbr.rel (%p2197_p8) target bundleno = 1221 (0x4c5), region = 72  ;;  %v2205_v13 = vpack.c.bf16 (!%p2197_p8), %v4325_v39, %v4449_v32  ;;  %v2206_v44 = vpack.c.bf16 (!%p2197_p8), %v4253_v40, %v4393_v51  ;;  %v2207_v59 = vpack.c.bf16 (!%p2197_p8), %v4424_v35, %v4479_v50  ;;  %v2208_v20 = vpack.c.bf16 (!%p2197_p8), %v4467_v52, %v4491_v54 }
 0x4bd   : > { %2474 = vst [vmem:[#allocation2 + $0x80] sm:$0xff] (!%p2197_p8), %v2201_v25  ;;  %2475 = vst [vmem:[#allocation2 + $0x88] sm:$0xff] (!%p2197_p8), %v2202_v8  ;;  %v2209_v55 = vpack.c.bf16 (!%p2197_p8), %v4013_v5, %v4060_v26  ;;  %v2210_v29 = vpack.c.bf16 (!%p2197_p8), %v3984_v38, %v4034_v21  ;;  %v2211_v61 = vpack.c.bf16 (!%p2197_p8), %v4196_v47, %v4302_v42 }
 0x4be   : > { %2476 = vst [vmem:[#allocation2 + $0x90] sm:$0xff] (!%p2197_p8), %v2203_v3  ;;  %2477 = vst [vmem:[#allocation2 + $0x98] sm:$0xff] (!%p2197_p8), %v2204_v34  ;;  %v2212_v49 = vpack.c.bf16 (!%p2197_p8), %v4132_v27, %v4227_v60  ;;  %v2213_v58 = vpack.c.bf16 (!%p2197_p8), %v4338_v41, %v4461_v56  ;;  %v2214_v33 = vpack.c.bf16 (!%p2197_p8), %v4261_v18, %v4399_v48 }
 0x4bf   : > { %2478 = vst [vmem:[#allocation2 + $0xa0] sm:$0xff] (!%p2197_p8), %v2205_v13  ;;  %2479 = vst [vmem:[#allocation2 + $0xa8] sm:$0xff] (!%p2197_p8), %v2206_v44  ;;  %v2215_v19 = vpack.c.bf16 (!%p2197_p8), %v4435_v12, %v4485_v6  ;;  %v2216_v53 = vpack.c.bf16 (!%p2197_p8), %v4473_v23, %v4497_v43 }
 0x4c0   : > { %2480 = vst [vmem:[#allocation2 + $0xb0] sm:$0xff] (!%p2197_p8), %v2207_v59  ;;  %2481 = vst [vmem:[#allocation2 + $0xb8] sm:$0xff] (!%p2197_p8), %v2208_v20 }
 0x4c1   : > { %2482 = vst [vmem:[#allocation2 + $0xc0] sm:$0xff] (!%p2197_p8), %v2209_v55  ;;  %2483 = vst [vmem:[#allocation2 + $0xc8] sm:$0xff] (!%p2197_p8), %v2210_v29 }
 0x4c2   : > { %2484 = vst [vmem:[#allocation2 + $0xd0] sm:$0xff] (!%p2197_p8), %v2211_v61  ;;  %2485 = vst [vmem:[#allocation2 + $0xd8] sm:$0xff] (!%p2197_p8), %v2212_v49 }
 0x4c3   : > { %2486 = vst [vmem:[#allocation2 + $0xe0] sm:$0xff] %v2213_v58  ;;  %2487 = vst [vmem:[#allocation2 + $0xe8] sm:$0xff] %v2214_v33 }
 0x4c4   : > { %2488 = vst [vmem:[#allocation2 + $0xf0] sm:$0xff] %v2215_v19  ;;  %2489 = vst [vmem:[#allocation2 + $0xf8] sm:$0xff] %v2216_v53 }
 0x4c5 PF: > { %p2238_p6 = scmp.eq.s32.totalorder %s4800_s18, 1 }
 0x4c7   : > { %p2239_p13 = pnand %p2238_p6, %p2196_p3 }
 0x4c8   : > { %v2243_v2 = vpack.c.bf16 (!%p2239_p13), %v4005_v15, %v4047_v24  ;;  %v2244_v63 = vpack.c.bf16 (!%p2239_p13), %v3976_v14, %v4023_v46  ;;  %v2245_v28 = vpack.c.bf16 (!%p2239_p13), %v4181_v62, %v4286_v22  ;;  %v2246_v31 = vpack.c.bf16 (!%p2239_p13), %v4125_v17, %v4207_v10 }
 0x4c9   : > { %2242 = sbr.rel (%p2239_p13) target bundleno = 1234 (0x4d2), region = 76  ;;  %v2247_v57 = vpack.c.bf16 (!%p2239_p13), %v4325_v39, %v4449_v32  ;;  %v2248_v11 = vpack.c.bf16 (!%p2239_p13), %v4253_v40, %v4393_v51  ;;  %v2249_v9 = vpack.c.bf16 (!%p2239_p13), %v4424_v35, %v4479_v50  ;;  %v2250_v15 = vpack.c.bf16 (!%p2239_p13), %v4467_v52, %v4491_v54 }
 0x4ca   : > { %2263 = vst [vmem:[#allocation2] sm:$0xff] (!%p2239_p13), %v2243_v2  ;;  %2264 = vst [vmem:[#allocation2 + $0x8] sm:$0xff] (!%p2239_p13), %v2244_v63  ;;  %v2251_v14 = vpack.c.bf16 (!%p2239_p13), %v4013_v5, %v4060_v26  ;;  %v2252_v46 = vpack.c.bf16 (!%p2239_p13), %v3984_v38, %v4034_v21  ;;  %v2253_v24 = vpack.c.bf16 (!%p2239_p13), %v4196_v47, %v4302_v42 }
 0x4cb   : > { %2265 = vst [vmem:[#allocation2 + $0x10] sm:$0xff] (!%p2239_p13), %v2245_v28  ;;  %2266 = vst [vmem:[#allocation2 + $0x18] sm:$0xff] (!%p2239_p13), %v2246_v31  ;;  %v2254_v17 = vpack.c.bf16 (!%p2239_p13), %v4132_v27, %v4227_v60  ;;  %v2255_v62 = vpack.c.bf16 (!%p2239_p13), %v4338_v41, %v4461_v56  ;;  %v2256_v10 = vpack.c.bf16 (!%p2239_p13), %v4261_v18, %v4399_v48 }
 0x4cc   : > { %2267 = vst [vmem:[#allocation2 + $0x20] sm:$0xff] (!%p2239_p13), %v2247_v57  ;;  %2268 = vst [vmem:[#allocation2 + $0x28] sm:$0xff] (!%p2239_p13), %v2248_v11  ;;  %v2257_v5 = vpack.c.bf16 (!%p2239_p13), %v4435_v12, %v4485_v6  ;;  %v2258_v38 = vpack.c.bf16 (!%p2239_p13), %v4473_v23, %v4497_v43 }
 0x4cd   : > { %2269 = vst [vmem:[#allocation2 + $0x30] sm:$0xff] (!%p2239_p13), %v2249_v9  ;;  %2270 = vst [vmem:[#allocation2 + $0x38] sm:$0xff] (!%p2239_p13), %v2250_v15 }
 0x4ce   : > { %2271 = vst [vmem:[#allocation2 + $0x40] sm:$0xff] (!%p2239_p13), %v2251_v14  ;;  %2272 = vst [vmem:[#allocation2 + $0x48] sm:$0xff] (!%p2239_p13), %v2252_v46 }
 0x4cf   : > { %2273 = vst [vmem:[#allocation2 + $0x50] sm:$0xff] (!%p2239_p13), %v2253_v24  ;;  %2274 = vst [vmem:[#allocation2 + $0x58] sm:$0xff] (!%p2239_p13), %v2254_v17 }
 0x4d0   : > { %2275 = vst [vmem:[#allocation2 + $0x60] sm:$0xff] %v2255_v62  ;;  %2276 = vst [vmem:[#allocation2 + $0x68] sm:$0xff] %v2256_v10 }
 0x4d1   : > { %2277 = vst [vmem:[#allocation2 + $0x70] sm:$0xff] %v2257_v5  ;;  %2278 = vst [vmem:[#allocation2 + $0x78] sm:$0xff] %v2258_v38 }
 0x4d2 PF: > { %p2707_p1 = scmp.eq.s32.totalorder %s3261_s24, 2  ;;  %s3199_s21 = smov [#allocation11]  }
 0x4d3   : > { %s2285_s29 = sshll.u32 %s3199_s21, 4  ;;  %s2286_s29 = int_to_ptr.vmem [resolvable:$true] %s2285_s29 }
 0x4d4   : > { %s3099_s11 = scalar_lea.vmem %s2286_s29, 4096  ;;  %p3106_p11 = scmp.lt.s32.totalorder %s2286_s29, %s2286_s29 }
 0x4d5   : > { %p3100_p4 = scmp.ne.s32.totalorder %s2286_s29, %s3099_s11  ;;  %p3107_p0 = scmp.lt.s32.totalorder %s3099_s11, %s3099_s11 }
 0x4d7   : > { %p3101_p10 = pnand %p3100_p4, %p2707_p1  ;;  %p3108_p7 = por %p3107_p0, %p3106_p11 }
 0x4d9   : > { %p3102_p5 = pneg %p3101_p10 }
 0x4db   : > { %p3109_p9 = pnand %p3108_p7, %p3102_p5 }
 0x4dd   : > { %3112 = shalt.err (!%p3109_p9)
}
 0x4de   : > { %s4788_s5 = sld [smem:[#allocation37_spill]] }
 0x4e4   : > { %s3113_s0 = scalar_lea.hbm %s4788_s5, 4096 }
 0x4e5   : > { %p3114_p2 = scmp.ne.s32.totalorder %s4788_s5, %s3113_s0  ;;  %p3119_p8 = scmp.lt.u32.totalorder %s3113_s0, %s4788_s5 }
 0x4e7   : > { %p3115_p12 = pnand %p3114_p2, %p2707_p1 }
 0x4e9   : > { %p3116_p3 = pneg %p3115_p12 }
 0x4eb   : > { %p3121_p6 = pnand %p3119_p8, %p3116_p3 }
 0x4ed   : > { %3124 = shalt.err (!%p3121_p6)
}
 0x4ee   : > { %s3200_s27 = smov 128   ;;  %s3201_s17 = smov 8  }
 0x4ef   : > { %2682 = dma.vmem_to_hbm [thread:$0]  (%p2707_p1), %s2286_s29, 4096, %s4788_s5, [#allocation5], %s3200_s27, %s3200_s27, %s3201_s17  }
 0x4f0   : > { %3162 = dma.done.wait (%p2707_p1), [#allocation5], 4096  }
 0x4f1   : > { %3164 = vsyncadd (%p2707_p1), [#allocation5], 4294963200 }
 0x4f2 PF: > { %s18_s23 = sadd.s32 1, %s3187_s23   ;;  %s4789_s2 = sld [smem:[#allocation16_spill]] }
 0x4f3   : > { %p15_p13 = scmp.ge.s32.totalorder %s18_s23, 5   ;;  %s4790_s18 = smov %s3171_s19 }
 0x4f4   : > { %s4791_s19 = smov %s3175_s20  ;;  %s4792_s20 = smov %s3330_s13 }
 0x4f5   : > { %s4793_s21 = smov %s3183_s22  ;;  %17 = sbr.rel (!%p15_p13) target bundleno = 10 (0xa), region = 130 }
 0x4f8   : > { %s4794_s22 = smov %s4789_s2 }
 0x4fc   :  { %2301 = vsyncpa [#allocation4], 1 }
 0x4fd   :  { %2303 = vsyncpa [#allocation4 + $0x1], 1 }
 0x4fe   :  { %2304 = vsyncpa [#allocation7], 1 }
 0x4ff   :  { %2305 = vsyncpa [#allocation5], 1 }
 0x500   :  { %2307 = vsyncpa [#allocation5 + $0x1], 1 }

</bundles_post_ra>
